<compile_context>
chip_gen: v5e
topology: v5e:2x2
jax: 0.10.0
libtpu: 0.0.40
codegen_flags: <defaults>
</compile_context>

<pallas_src>
import jax
import jax.numpy as jnp
from jax.experimental import pallas as pl
from jax.experimental.pallas import tpu as pltpu

# -------------------- problem sizes (small, deterministic) --------------------
B, N = 2, 16                 # batch, nodes
HID = 32                     # hidden_dim
H4 = HID // 4
TPOS, POI, WEA = 8, 8, 8     # tpos_dim, POI_dim, weather_dim
IN_CH = (2, 2, 2, 1)         # bike, taxi, bus, speed input channels
OUT_CH = (2, 2, 2, 1)        # decoder output channels
CTX_W = POI + WEA + TPOS     # 24
IN_W = 8 + CTX_W             # 32 : [flows(7)+pad(1) | POI | weather | tpos]
FW = 5 * HID                 # 160 : fused 5-factor lane width
OUTW = 4 * FW + 128          # 768 : [eps|mu|logvar|z_cur|rec+pad]

# internal factor lane order (flows first so decoder input is lanes 0:127):
#   internal d -> torch factor FACS[d];  torch f -> internal INV_FACS[f]
FACS = (1, 2, 3, 4, 0)       # bike, taxi, bus, speed, poi
INV_FACS = (4, 0, 1, 2, 3)


# -------------------------- deterministic parameters --------------------------
def kaiming_linear(key, fan_in, fan_out):
    # torch kaiming_normal_ on Linear weight [out, in]: std = sqrt(2 / fan_in).
    # We store the transposed [in, out] matrix directly.
    return jax.random.normal(key, (fan_in, fan_out), jnp.float32) * jnp.sqrt(2.0 / fan_in)


def init_params(key):
    ks = iter(jax.random.split(key, 64))
    p = {}
    # flow encoders: Linear(C, H) for bike/taxi/bus (C=2) and speed (C=1)
    p["w_flow_enc"] = jnp.stack([kaiming_linear(next(ks), 2, HID) for _ in range(3)])  # [3,2,H]
    p["b_flow_enc"] = jnp.zeros((3, 1, HID), jnp.float32)
    p["w_speed_enc"] = kaiming_linear(next(ks), 1, HID)                                # [1,H]
    p["b_speed_enc"] = jnp.zeros((1, HID), jnp.float32)

    # poi feature fusion: Linear(4H + POI + TPOS, H)
    # torch input order: [speed_f, bike_f, taxi_f, bus_f, POI, tpos]
    Wp = kaiming_linear(next(ks), 4 * HID + POI + TPOS, HID)
    p["w_poi_feats"] = jnp.stack([Wp[i * HID:(i + 1) * HID] for i in range(4)])        # [4,H,H]
    p["w_poi_ctx"] = Wp[4 * HID:]                                                      # [POI+TPOS, H]
    p["b_poi"] = jnp.zeros((1, HID), jnp.float32)

    # bike/taxi/bus/speed fusion: Linear(H + POI + WEA + TPOS, H)
    # torch input order: [feat, POI, weather, tpos]
    wf_feat, wf_ctx = [], []
    for _ in range(4):
        Wf = kaiming_linear(next(ks), HID + POI + WEA + TPOS, HID)
        wf_feat.append(Wf[:HID])
        wf_ctx.append(Wf[HID:])
    p["w_fus_feat"] = jnp.stack(wf_feat)                                               # [4,H,H]
    p["w_fus_ctx"] = jnp.stack(wf_ctx)                                                 # [4,24,H]
    p["b_fus"] = jnp.zeros((4, 1, HID), jnp.float32)

    # posterior_eps_* (FC branch): Linear(2H, H) + ReLU; input = [fusion, z_po_last_k]
    wa, wb = [], []
    for _ in range(5):
        We = kaiming_linear(next(ks), 2 * HID, HID)
        wa.append(We[:HID])
        wb.append(We[HID:])
    p["w_eps_a"] = jnp.stack(wa)                                                       # [5,H,H]
    p["w_eps_b"] = jnp.stack(wb)                                                       # [5,H,H]
    p["b_eps"] = jnp.zeros((5, 1, HID), jnp.float32)

    # shared mu / logvar heads: Linear(H, H)
    p["w_mu"] = kaiming_linear(next(ks), HID, HID)
    p["b_mu"] = jnp.zeros((1, HID), jnp.float32)
    p["w_lv"] = kaiming_linear(next(ks), HID, HID)
    p["b_lv"] = jnp.zeros((1, HID), jnp.float32)

    # decoders: Linear(H, H//4) -> ReLU -> Linear(H//4, out_c); 2nd matmul padded to 2.
    w1, w2 = [], []
    for oc in OUT_CH:
        w1.append(kaiming_linear(next(ks), HID, H4))
        w2_k = kaiming_linear(next(ks), H4, oc)
        if oc < 2:
            w2_k = jnp.pad(w2_k, ((0, 0), (0, 2 - oc)))
        w2.append(w2_k)
    p["w_dec1"] = jnp.stack(w1)                                                        # [4,H,H4]
    p["b_dec1"] = jnp.zeros((4, 1, H4), jnp.float32)
    p["w_dec2"] = jnp.stack(w2)                                                        # [4,H4,2]
    p["b_dec2"] = jnp.zeros((4, 1, 2), jnp.float32)
    return p


# -------------------- fused / lane-dense weight packing ------------------------
def pack_params(p):
    """Packed once at init (NOT per forward call).  All weights are lane-dense
    block-diagonal matrices in the internal factor order [bike,taxi,bus,speed,poi]."""
    H = HID
    enc_w = [p["w_flow_enc"][0], p["w_flow_enc"][1], p["w_flow_enc"][2], p["w_speed_enc"]]
    enc_b = [p["b_flow_enc"][0], p["b_flow_enc"][1], p["b_flow_enc"][2], p["b_speed_enc"]]
    flow_rows = ((0, 2), (2, 4), (4, 6), (6, 7))   # bike, taxi, bus, speed rows in x
    poi_idx = (1, 2, 3, 0)  # modality m -> index into w_poi_feats (torch order speed,bike,taxi,bus)

    pk = {}

    # (a) fused input layer (encoders folded in, no nonlinearity between them):
    #     x = [flows(8) | POI(8) | weather(8) | tpos(8)]  ->  fus(160)
    w_in = jnp.zeros((IN_W, FW), jnp.float32)
    b_in = jnp.zeros((1, FW), jnp.float32)
    for m in range(4):
        r0, r1 = flow_rows[m]
        # per-modality fusion block (internal lane block m)
        w_in = w_in.at[r0:r1, m * H:(m + 1) * H].set(enc_w[m] @ p["w_fus_feat"][m])
        # poi fusion block (internal lane block 4): all 4 encoded features contribute
        w_in = w_in.at[r0:r1, 4 * H:5 * H].set(enc_w[m] @ p["w_poi_feats"][poi_idx[m]])
        # ctx rows [POI | weather | tpos] for modality fusions
        w_in = w_in.at[8:8 + CTX_W, m * H:(m + 1) * H].set(p["w_fus_ctx"][m])
        b_in = b_in.at[:, m * H:(m + 1) * H].set(p["b_fus"][m] + enc_b[m] @ p["w_fus_feat"][m])
    # poi ctx = [POI, tpos] (no weather rows)
    w_in = w_in.at[8:8 + POI, 4 * H:5 * H].set(p["w_poi_ctx"][:POI])
    w_in = w_in.at[8 + POI + WEA:8 + CTX_W, 4 * H:5 * H].set(p["w_poi_ctx"][POI:])
    b_poi = p["b_poi"] + sum(enc_b[m] @ p["w_poi_feats"][poi_idx[m]] for m in range(4))
    b_in = b_in.at[:, 4 * H:5 * H].set(b_poi)
    pk["w_in"], pk["b_in"] = w_in, b_in

    # (b) 5 eps heads in ONE block-diagonal dot: [fus(160) | z_last(160)] -> eps(160)
    w_eps = jnp.zeros((2 * FW, FW), jnp.float32)
    b_eps = jnp.zeros((1, FW), jnp.float32)
    for d, f in enumerate(FACS):
        w_eps = w_eps.at[d * H:(d + 1) * H, d * H:(d + 1) * H].set(p["w_eps_a"][f])
        w_eps = w_eps.at[FW + d * H:FW + (d + 1) * H, d * H:(d + 1) * H].set(p["w_eps_b"][f])
        b_eps = b_eps.at[:, d * H:(d + 1) * H].set(p["b_eps"][f])
    pk["w_eps"], pk["b_eps"] = w_eps, b_eps

    # (c) shared mu/logvar heads lane-wise: eps(160) -> [mu(160) | logvar(160)]
    w_mulv = jnp.zeros((FW, 2 * FW), jnp.float32)
    b_mulv = jnp.zeros((1, 2 * FW), jnp.float32)
    for d in range(5):
        w_mulv = w_mulv.at[d * H:(d + 1) * H, d * H:(d + 1) * H].set(p["w_mu"])
        w_mulv = w_mulv.at[d * H:(d + 1) * H, FW + d * H:FW + (d + 1) * H].set(p["w_lv"])
        b_mulv = b_mulv.at[:, d * H:(d + 1) * H].set(p["b_mu"])
        b_mulv = b_mulv.at[:, FW + d * H:FW + (d + 1) * H].set(p["b_lv"])
    pk["w_mulv"], pk["b_mulv"] = w_mulv, b_mulv

    # (d) decoders: block-diagonal first layer (128->32), padded lane-dense second (32->128)
    w_d1 = jnp.zeros((4 * H, 4 * H4), jnp.float32)
    for d in range(4):
        w_d1 = w_d1.at[d * H:(d + 1) * H, d * H4:(d + 1) * H4].set(p["w_dec1"][d])
    pk["w_d1"] = w_d1
    pk["b_d1"] = jnp.concatenate([p["b_dec1"][d] for d in range(4)], axis=1)           # (1,32)
    w_d2 = jnp.zeros((4 * H4, 128), jnp.float32)
    b_d2 = jnp.zeros((1, 128), jnp.float32)
    for d in range(4):
        oc = OUT_CH[d]
        w_d2 = w_d2.at[d * H4:(d + 1) * H4, 2 * d:2 * d + oc].set(p["w_dec2"][d][:, :oc])
        b_d2 = b_d2.at[:, 2 * d:2 * d + oc].set(p["b_dec2"][d][:, :oc])
    pk["w_d2"], pk["b_d2"] = w_d2, b_d2
    return pk


# ---------------------------------- kernel ------------------------------------
def make_kernel(test):
    """test is a trace-time Python bool: the test=True variant takes no noise ref."""

    def kernel(*refs):
        if test:
            (x_ref, zl_ref,
             w_in_ref, b_in_ref, w_eps_ref, b_eps_ref,
             w_mulv_ref, b_mulv_ref, w_d1_ref, b_d1_ref, w_d2_ref, b_d2_ref,
             out_ref) = refs
            noise_ref = None
        else:
            (x_ref, zl_ref, noise_ref,
             w_in_ref, b_in_ref, w_eps_ref, b_eps_ref,
             w_mulv_ref, b_mulv_ref, w_d1_ref, b_d1_ref, w_d2_ref, b_d2_ref,
             out_ref) = refs

        def dot(a, b):
            return jnp.dot(a, b, preferred_element_type=jnp.float32)

        # (1) input encoders + all 5 feature fusions, folded into ONE dot
        fus = dot(x_ref[...], w_in_ref[...]) + b_in_ref[...]                    # (TM,160)

        # (2) 5 eps heads: one block-diagonal fused-K dot + ReLU
        eps_in = jnp.concatenate([fus, zl_ref[...]], axis=1)                    # (TM,320)
        eps_all = jnp.maximum(dot(eps_in, w_eps_ref[...]) + b_eps_ref[...], 0.0)  # (TM,160)

        # SCM_model is external; identity here.
        # TODO(synk): plug a real SCM_model mapping eps -> z when one is defined.

        # (3) shared mu/logvar heads, lane-wise (mu lanes 0:160, logvar lanes 160:320)
        mulv = dot(eps_all, w_mulv_ref[...]) + b_mulv_ref[...]                  # (TM,320)
        mu_all = mulv[:, :FW]
        lv_all = mulv[:, FW:]
        if test:
            zc_all = mu_all                                                     # reparameterize(test=True)
        else:
            zc_all = mu_all + noise_ref[...] * jnp.exp(0.5 * lv_all)            # (TM,160)

        # (4) decoders: flows occupy lanes 0:127 -> vreg-aligned slice, two block-diag dots
        h = jnp.maximum(dot(zc_all[:, :4 * HID], w_d1_ref[...]) + b_d1_ref[...], 0.0)  # (TM,32)
        rec = dot(h, w_d2_ref[...]) + b_d2_ref[...]                             # (TM,128): 8 valid + pad

        # (5) single lane-dense output slab, one unmasked 768-lane store
        out_ref[...] = jnp.concatenate([eps_all, mu_all, lv_all, zc_all, rec], axis=1)

    return kernel


# --------------------------------- wrapper -------------------------------------
def choose_tile(m):
    """Single grid step at small M (per-step overhead ~0.35us + MXU fill/drain
    dominates the tiny dots).  Only tile — and let the 'parallel' axis shard
    across v7x's two TensorCores — once M is large enough to pay it back.
    VMEM is never a constraint here (<1 MiB of weights + tiles per step)."""
    if m <= 512:
        return m
    tm = 512
    while tm > 8 and m % tm:
        tm -= 8
    return tm if (tm >= 8 and m % tm == 0) else m


def _posterior_net_forward(pk, tpos, poi, weather, bike, taxi, bus, speed,
                           z_po_last, noise=None, *, test=False):
    B_, N_ = bike.shape[:2]
    M_ = B_ * N_
    flat = lambda a: a.reshape(M_, a.shape[-1]).astype(jnp.float32)

    # fused lane-dense input: [bike(2)|taxi(2)|bus(2)|speed(1)|pad(1)|POI|weather|tpos]
    flows = jnp.concatenate([flat(bike), flat(taxi), flat(bus), flat(speed)], axis=-1)  # (M,7)
    flows = jnp.pad(flows, ((0, 0), (0, 8 - flows.shape[-1])))
    x = jnp.concatenate([flows, flat(poi), flat(weather), flat(tpos)], axis=-1)         # (M,32)

    facs = jnp.asarray(FACS)
    zlast = z_po_last[:, :, facs, :].reshape(M_, FW).astype(jnp.float32)                # (M,160)

    TM = choose_tile(M_)
    grid = (M_ // TM,)
    rspec = lambda c: pl.BlockSpec((TM, c), lambda i: (i, 0))
    wspec = lambda a: pl.BlockSpec(a.shape, lambda i: (0, 0))

    weights = [pk["w_in"], pk["b_in"], pk["w_eps"], pk["b_eps"],
               pk["w_mulv"], pk["b_mulv"], pk["w_d1"], pk["b_d1"],
               pk["w_d2"], pk["b_d2"]]

    if test:
        # inference path: skip the noise HBM->VMEM stream entirely
        ins = [x, zlast] + weights
        in_specs = [rspec(IN_W), rspec(FW)] + [wspec(w) for w in weights]
    else:
        noise_l = noise[:, :, facs, :].reshape(M_, FW).astype(jnp.float32)              # (M,160)
        ins = [x, zlast, noise_l] + weights
        in_specs = [rspec(IN_W), rspec(FW), rspec(FW)] + [wspec(w) for w in weights]

    out = pl.pallas_call(
        make_kernel(test),
        grid=grid,
        in_specs=in_specs,
        out_specs=pl.BlockSpec((TM, OUTW), lambda i: (i, 0)),
        out_shape=jax.ShapeDtypeStruct((M_, OUTW), jnp.float32),
        compiler_params=pltpu.CompilerParams(dimension_semantics=("parallel",)),
    )(*ins)

    # reshape-only split of the lane-dense slab; permute factors back to torch order
    blk = out[:, :4 * FW].reshape(M_, 4, 5, HID)
    blk = blk[:, :, jnp.asarray(INV_FACS), :].reshape(B_, N_, 4, 5, HID)
    eps = blk[:, :, 0]
    z_mu = blk[:, :, 1]
    z_logvar = blk[:, :, 2]
    z_cur = blk[:, :, 3]
    rec = out[:, 4 * FW:4 * FW + 8].reshape(B_, N_, 8)
    bike_rec = rec[..., 0:0 + OUT_CH[0]]
    taxi_rec = rec[..., 2:2 + OUT_CH[1]]
    bus_rec = rec[..., 4:4 + OUT_CH[2]]
    speed_rec = rec[..., 6:6 + OUT_CH[3]]
    hidden = None
    return eps, z_logvar, z_mu, z_logvar, z_cur, bike_rec, taxi_rec, bus_rec, speed_rec, hidden


posterior_net_forward = jax.jit(_posterior_net_forward, static_argnames=("test",))


# ----------------------------- pure-JAX reference ------------------------------
def ref_forward(p, tpos, poi, weather, bike, taxi, bus, speed, z_last, noise):
    bike_f = bike @ p["w_flow_enc"][0] + p["b_flow_enc"][0]
    taxi_f = taxi @ p["w_flow_enc"][1] + p["b_flow_enc"][1]
    bus_f = bus @ p["w_flow_enc"][2] + p["b_flow_enc"][2]
    speed_f = speed @ p["w_speed_enc"] + p["b_speed_enc"]
    ctx_poi = jnp.concatenate([poi, tpos], -1)
    ctx = jnp.concatenate([poi, weather, tpos], -1)
    poi_fus = (speed_f @ p["w_poi_feats"][0] + bike_f @ p["w_poi_feats"][1]
               + taxi_f @ p["w_poi_feats"][2] + bus_f @ p["w_poi_feats"][3]
               + ctx_poi @ p["w_poi_ctx"] + p["b_poi"])
    feats = (bike_f, taxi_f, bus_f, speed_f)
    fus = [poi_fus] + [feats[k] @ p["w_fus_feat"][k] + ctx @ p["w_fus_ctx"][k] + p["b_fus"][k]
                       for k in range(4)]
    eps, mus, lvs, zcs = [], [], [], []
    for k in range(5):
        e = jax.nn.relu(fus[k] @ p["w_eps_a"][k] + z_last[:, :, k, :] @ p["w_eps_b"][k] + p["b_eps"][k])
        eps.append(e)
        mu = e @ p["w_mu"] + p["b_mu"]
        lv = e @ p["w_lv"] + p["b_lv"]
        zcs.append(mu + noise[:, :, k, :] * jnp.exp(0.5 * lv))
        mus.append(mu)
        lvs.append(lv)
    recs = []
    for d in range(4):
        h = jax.nn.relu(zcs[d + 1] @ p["w_dec1"][d] + p["b_dec1"][d])
        recs.append(h @ p["w_dec2"][d][:, :OUT_CH[d]] + p["b_dec2"][d][:, :OUT_CH[d]])
    stack = lambda xs: jnp.stack(xs, axis=2)
    return (stack(eps), stack(lvs), stack(mus), stack(lvs), stack(zcs),
            recs[0], recs[1], recs[2], recs[3], None)


# ----------------------------------- main ---------------------------------------
if __name__ == "__main__":
    key = jax.random.PRNGKey(0)
    kp, kd = jax.random.split(key)
    params = init_params(kp)
    packed = pack_params(params)          # packed ONCE, reused across calls

    ks = jax.random.split(kd, 9)
    tpos = jax.random.normal(ks[0], (B, N, TPOS), jnp.float32)
    poi = jax.random.normal(ks[1], (B, N, POI), jnp.float32)
    weather = jax.random.normal(ks[2], (B, N, WEA), jnp.float32)
    bike = jax.random.normal(ks[3], (B, N, IN_CH[0]), jnp.float32)
    taxi = jax.random.normal(ks[4], (B, N, IN_CH[1]), jnp.float32)
    bus = jax.random.normal(ks[5], (B, N, IN_CH[2]), jnp.float32)
    speed = jax.random.normal(ks[6], (B, N, IN_CH[3]), jnp.float32)
    z_po_last = jax.random.normal(ks[7], (B, N, 5, HID), jnp.float32)
    noise = jax.random.normal(ks[8], (B, N, 5, HID), jnp.float32)  # reparameterize noise

    # --- training path (reparameterized with explicit noise) ---
    outs = posterior_net_forward(packed, tpos, poi, weather, bike, taxi, bus, speed,
                                 z_po_last, noise, test=False)
    outs = jax.block_until_ready(outs)
    refs = ref_forward(params, tpos, poi, weather, bike, taxi, bus, speed, z_po_last, noise)
    for got, want in zip(outs[:-1], refs[:-1]):
        assert got.shape == want.shape, (got.shape, want.shape)
        assert jnp.allclose(got, want, atol=1e-4, rtol=1e-4), "kernel/reference mismatch (train)"

    # --- inference path (test=True: no noise stream, z_cur = mu) ---
    outs_t = posterior_net_forward(packed, tpos, poi, weather, bike, taxi, bus, speed,
                                   z_po_last, None, test=True)
    outs_t = jax.block_until_ready(outs_t)
    refs_t = ref_forward(params, tpos, poi, weather, bike, taxi, bus, speed,
                         z_po_last, jnp.zeros_like(noise))
    for got, want in zip(outs_t[:-1], refs_t[:-1]):
        assert got.shape == want.shape, (got.shape, want.shape)
        assert jnp.allclose(got, want, atol=1e-4, rtol=1e-4), "kernel/reference mismatch (test)"

    print("KERNEL_OK")
</pallas_src>

<mosaic_0001>
module attributes {stable_mosaic.version = 11 : i64} {
  func.func @kernel(%arg0: i32, %arg1: memref<32x32xf32, #tpu.memory_space<vmem>>, %arg2: memref<32x160xf32, #tpu.memory_space<vmem>>, %arg3: memref<32x160xf32, #tpu.memory_space<vmem>>, %arg4: memref<32x160xf32, #tpu.memory_space<vmem>>, %arg5: memref<1x160xf32, #tpu.memory_space<vmem>>, %arg6: memref<320x160xf32, #tpu.memory_space<vmem>>, %arg7: memref<1x160xf32, #tpu.memory_space<vmem>>, %arg8: memref<160x320xf32, #tpu.memory_space<vmem>>, %arg9: memref<1x320xf32, #tpu.memory_space<vmem>>, %arg10: memref<128x32xf32, #tpu.memory_space<vmem>>, %arg11: memref<1x32xf32, #tpu.memory_space<vmem>>, %arg12: memref<32x128xf32, #tpu.memory_space<vmem>>, %arg13: memref<1x128xf32, #tpu.memory_space<vmem>>, %arg14: memref<32x768xf32, #tpu.memory_space<vmem>>) attributes {dimension_semantics = [#tpu.dimension_semantics<parallel>], iteration_bounds = array<i64: 1>, scalar_prefetch = 0 : i64, scratch_operands = 0 : i64, tpu.core_type = #tpu.core_type<tc>, window_params = [{transform_indices = @transform_0, window_bounds = array<i64: 32, 32>}, {transform_indices = @transform_1, window_bounds = array<i64: 32, 160>}, {transform_indices = @transform_2, window_bounds = array<i64: 32, 160>}, {pipeline_mode = #tpu.pipeline_mode<synchronous>, transform_indices = @transform_3, window_bounds = array<i64: 32, 160>}, {pipeline_mode = #tpu.pipeline_mode<synchronous>, transform_indices = @transform_4, window_bounds = array<i64: 1, 160>}, {pipeline_mode = #tpu.pipeline_mode<synchronous>, transform_indices = @transform_5, window_bounds = array<i64: 320, 160>}, {pipeline_mode = #tpu.pipeline_mode<synchronous>, transform_indices = @transform_6, window_bounds = array<i64: 1, 160>}, {pipeline_mode = #tpu.pipeline_mode<synchronous>, transform_indices = @transform_7, window_bounds = array<i64: 160, 320>}, {pipeline_mode = #tpu.pipeline_mode<synchronous>, transform_indices = @transform_8, window_bounds = array<i64: 1, 320>}, {pipeline_mode = #tpu.pipeline_mode<synchronous>, transform_indices = @transform_9, window_bounds = array<i64: 128, 32>}, {pipeline_mode = #tpu.pipeline_mode<synchronous>, transform_indices = @transform_10, window_bounds = array<i64: 1, 32>}, {pipeline_mode = #tpu.pipeline_mode<synchronous>, transform_indices = @transform_11, window_bounds = array<i64: 32, 128>}, {pipeline_mode = #tpu.pipeline_mode<synchronous>, transform_indices = @transform_12, window_bounds = array<i64: 1, 128>}, {transform_indices = @transform_13, window_bounds = array<i64: 32, 768>}]} {
    %c0 = arith.constant 0 : index
    %c0_0 = arith.constant 0 : index
    %0 = vector.load %arg1[%c0, %c0_0] : memref<32x32xf32, #tpu.memory_space<vmem>>, vector<32x32xf32>
    %c0_1 = arith.constant 0 : index
    %c0_2 = arith.constant 0 : index
    %1 = vector.load %arg4[%c0_1, %c0_2] : memref<32x160xf32, #tpu.memory_space<vmem>>, vector<32x160xf32>
    %cst = arith.constant dense<0.000000e+00> : vector<32x160xf32>
    %2 = tpu.matmul %0, %1, %cst {dimension_numbers = #tpu.dot_dimension_numbers<[1], [0], [0], [1], [0, 0, 1, 1], [], []>} : vector<32x32xf32>, vector<32x160xf32>, vector<32x160xf32> -> vector<32x160xf32>
    %c0_3 = arith.constant 0 : index
    %c0_4 = arith.constant 0 : index
    %3 = vector.load %arg5[%c0_3, %c0_4] : memref<1x160xf32, #tpu.memory_space<vmem>>, vector<1x160xf32>
    %4 = vector.broadcast %3 : vector<1x160xf32> to vector<32x160xf32>
    %5 = arith.addf %2, %4 : vector<32x160xf32>
    %c0_5 = arith.constant 0 : index
    %c0_6 = arith.constant 0 : index
    %6 = vector.load %arg2[%c0_5, %c0_6] : memref<32x160xf32, #tpu.memory_space<vmem>>, vector<32x160xf32>
    %7 = tpu.concatenate %5, %6 in 1 : vector<32x160xf32>, vector<32x160xf32> -> vector<32x320xf32>
    %c0_7 = arith.constant 0 : index
    %c0_8 = arith.constant 0 : index
    %8 = vector.load %arg6[%c0_7, %c0_8] : memref<320x160xf32, #tpu.memory_space<vmem>>, vector<320x160xf32>
    %cst_9 = arith.constant dense<0.000000e+00> : vector<32x160xf32>
    %9 = tpu.matmul %7, %8, %cst_9 {dimension_numbers = #tpu.dot_dimension_numbers<[1], [0], [0], [1], [0, 0, 1, 1], [], []>} : vector<32x320xf32>, vector<320x160xf32>, vector<32x160xf32> -> vector<32x160xf32>
    %c0_10 = arith.constant 0 : index
    %c0_11 = arith.constant 0 : index
    %10 = vector.load %arg7[%c0_10, %c0_11] : memref<1x160xf32, #tpu.memory_space<vmem>>, vector<1x160xf32>
    %11 = vector.broadcast %10 : vector<1x160xf32> to vector<32x160xf32>
    %12 = arith.addf %9, %11 : vector<32x160xf32>
    %cst_12 = arith.constant 0.000000e+00 : f32
    %13 = vector.broadcast %cst_12 : f32 to vector<32x160xf32>
    %14 = arith.maximumf %12, %13 : vector<32x160xf32>
    %c0_13 = arith.constant 0 : index
    %c0_14 = arith.constant 0 : index
    %15 = vector.load %arg8[%c0_13, %c0_14] : memref<160x320xf32, #tpu.memory_space<vmem>>, vector<160x320xf32>
    %cst_15 = arith.constant dense<0.000000e+00> : vector<32x320xf32>
    %16 = tpu.matmul %14, %15, %cst_15 {dimension_numbers = #tpu.dot_dimension_numbers<[1], [0], [0], [1], [0, 0, 1, 1], [], []>} : vector<32x160xf32>, vector<160x320xf32>, vector<32x320xf32> -> vector<32x320xf32>
    %c0_16 = arith.constant 0 : index
    %c0_17 = arith.constant 0 : index
    %17 = vector.load %arg9[%c0_16, %c0_17] : memref<1x320xf32, #tpu.memory_space<vmem>>, vector<1x320xf32>
    %18 = vector.broadcast %17 : vector<1x320xf32> to vector<32x320xf32>
    %19 = arith.addf %16, %18 : vector<32x320xf32>
    %20 = vector.extract_strided_slice %19 {offsets = [0, 0], sizes = [32, 160], strides = [1, 1]} : vector<32x320xf32> to vector<32x160xf32>
    %21 = vector.extract_strided_slice %19 {offsets = [0, 160], sizes = [32, 160], strides = [1, 1]} : vector<32x320xf32> to vector<32x160xf32>
    %c0_18 = arith.constant 0 : index
    %c0_19 = arith.constant 0 : index
    %22 = vector.load %arg3[%c0_18, %c0_19] : memref<32x160xf32, #tpu.memory_space<vmem>>, vector<32x160xf32>
    %cst_20 = arith.constant 5.000000e-01 : f32
    %23 = vector.broadcast %cst_20 : f32 to vector<32x160xf32>
    %24 = arith.mulf %23, %21 : vector<32x160xf32>
    %25 = math.exp %24 : vector<32x160xf32>
    %26 = arith.mulf %22, %25 : vector<32x160xf32>
    %27 = arith.addf %20, %26 : vector<32x160xf32>
    %28 = vector.extract_strided_slice %27 {offsets = [0, 0], sizes = [32, 128], strides = [1, 1]} : vector<32x160xf32> to vector<32x128xf32>
    %c0_21 = arith.constant 0 : index
    %c0_22 = arith.constant 0 : index
    %29 = vector.load %arg10[%c0_21, %c0_22] : memref<128x32xf32, #tpu.memory_space<vmem>>, vector<128x32xf32>
    %cst_23 = arith.constant dense<0.000000e+00> : vector<32x32xf32>
    %30 = tpu.matmul %28, %29, %cst_23 {dimension_numbers = #tpu.dot_dimension_numbers<[1], [0], [0], [1], [0, 0, 1, 1], [], []>} : vector<32x128xf32>, vector<128x32xf32>, vector<32x32xf32> -> vector<32x32xf32>
    %c0_24 = arith.constant 0 : index
    %c0_25 = arith.constant 0 : index
    %31 = vector.load %arg11[%c0_24, %c0_25] : memref<1x32xf32, #tpu.memory_space<vmem>>, vector<1x32xf32>
    %32 = vector.broadcast %31 : vector<1x32xf32> to vector<32x32xf32>
    %33 = arith.addf %30, %32 : vector<32x32xf32>
    %cst_26 = arith.constant 0.000000e+00 : f32
    %34 = vector.broadcast %cst_26 : f32 to vector<32x32xf32>
    %35 = arith.maximumf %33, %34 : vector<32x32xf32>
    %c0_27 = arith.constant 0 : index
    %c0_28 = arith.constant 0 : index
    %36 = vector.load %arg12[%c0_27, %c0_28] : memref<32x128xf32, #tpu.memory_space<vmem>>, vector<32x128xf32>
    %cst_29 = arith.constant dense<0.000000e+00> : vector<32x128xf32>
    %37 = tpu.matmul %35, %36, %cst_29 {dimension_numbers = #tpu.dot_dimension_numbers<[1], [0], [0], [1], [0, 0, 1, 1], [], []>} : vector<32x32xf32>, vector<32x128xf32>, vector<32x128xf32> -> vector<32x128xf32>
    %c0_30 = arith.constant 0 : index
    %c0_31 = arith.constant 0 : index
    %38 = vector.load %arg13[%c0_30, %c0_31] : memref<1x128xf32, #tpu.memory_space<vmem>>, vector<1x128xf32>
    %39 = vector.broadcast %38 : vector<1x128xf32> to vector<32x128xf32>
    %40 = arith.addf %37, %39 : vector<32x128xf32>
    %41 = tpu.concatenate %14, %20, %21, %27, %40 in 1 : vector<32x160xf32>, vector<32x160xf32>, vector<32x160xf32>, vector<32x160xf32>, vector<32x128xf32> -> vector<32x768xf32>
    %c0_32 = arith.constant 0 : index
    %c0_33 = arith.constant 0 : index
    %42 = vector.load %arg14[%c0_32, %c0_33] : memref<32x768xf32, #tpu.memory_space<vmem>>, vector<32x768xf32>
    tpu.vector_store %arg14[%c0_32, %c0_33], %41 {strides = array<i32>} : memref<32x768xf32, #tpu.memory_space<vmem>>, vector<32x768xf32>,
    return
  }
  func.func @transform_0(%arg0: i32) -> (i32, i32) {
    %c0_i32 = arith.constant 0 : i32
    %c0_i32_0 = arith.constant 0 : i32
    return %arg0, %c0_i32 : i32, i32
  }
  func.func @transform_1(%arg0: i32) -> (i32, i32) {
    %c0_i32 = arith.constant 0 : i32
    %c0_i32_0 = arith.constant 0 : i32
    return %arg0, %c0_i32 : i32, i32
  }
  func.func @transform_2(%arg0: i32) -> (i32, i32) {
    %c0_i32 = arith.constant 0 : i32
    %c0_i32_0 = arith.constant 0 : i32
    return %arg0, %c0_i32 : i32, i32
  }
  func.func @transform_3(%arg0: i32) -> (i32, i32) {
    %c0_i32 = arith.constant 0 : i32
    %c0_i32_0 = arith.constant 0 : i32
    %c0_i32_1 = arith.constant 0 : i32
    return %c0_i32, %c0_i32_0 : i32, i32
  }
  func.func @transform_4(%arg0: i32) -> (i32, i32) {
    %c0_i32 = arith.constant 0 : i32
    %c0_i32_0 = arith.constant 0 : i32
    %c0_i32_1 = arith.constant 0 : i32
    return %c0_i32, %c0_i32_0 : i32, i32
  }
  func.func @transform_5(%arg0: i32) -> (i32, i32) {
    %c0_i32 = arith.constant 0 : i32
    %c0_i32_0 = arith.constant 0 : i32
    %c0_i32_1 = arith.constant 0 : i32
    return %c0_i32, %c0_i32_0 : i32, i32
  }
  func.func @transform_6(%arg0: i32) -> (i32, i32) {
    %c0_i32 = arith.constant 0 : i32
    %c0_i32_0 = arith.constant 0 : i32
    %c0_i32_1 = arith.constant 0 : i32
    return %c0_i32, %c0_i32_0 : i32, i32
  }
  func.func @transform_7(%arg0: i32) -> (i32, i32) {
    %c0_i32 = arith.constant 0 : i32
    %c0_i32_0 = arith.constant 0 : i32
    %c0_i32_1 = arith.constant 0 : i32
    return %c0_i32, %c0_i32_0 : i32, i32
  }
  func.func @transform_8(%arg0: i32) -> (i32, i32) {
    %c0_i32 = arith.constant 0 : i32
    %c0_i32_0 = arith.constant 0 : i32
    %c0_i32_1 = arith.constant 0 : i32
    return %c0_i32, %c0_i32_0 : i32, i32
  }
  func.func @transform_9(%arg0: i32) -> (i32, i32) {
    %c0_i32 = arith.constant 0 : i32
    %c0_i32_0 = arith.constant 0 : i32
    %c0_i32_1 = arith.constant 0 : i32
    return %c0_i32, %c0_i32_0 : i32, i32
  }
  func.func @transform_10(%arg0: i32) -> (i32, i32) {
    %c0_i32 = arith.constant 0 : i32
    %c0_i32_0 = arith.constant 0 : i32
    %c0_i32_1 = arith.constant 0 : i32
    return %c0_i32, %c0_i32_0 : i32, i32
  }
  func.func @transform_11(%arg0: i32) -> (i32, i32) {
    %c0_i32 = arith.constant 0 : i32
    %c0_i32_0 = arith.constant 0 : i32
    %c0_i32_1 = arith.constant 0 : i32
    return %c0_i32, %c0_i32_0 : i32, i32
  }
  func.func @transform_12(%arg0: i32) -> (i32, i32) {
    %c0_i32 = arith.constant 0 : i32
    %c0_i32_0 = arith.constant 0 : i32
    %c0_i32_1 = arith.constant 0 : i32
    return %c0_i32, %c0_i32_0 : i32, i32
  }
  func.func @transform_13(%arg0: i32) -> (i32, i32) {
    %c0_i32 = arith.constant 0 : i32
    %c0_i32_0 = arith.constant 0 : i32
    return %arg0, %c0_i32 : i32, i32
  }
}

</mosaic_0001>

<bundles_post_ra>
// kernel: _posterior_net_forward.1
= control target key start
LH: loop header
LB: loop body
LE: loop exit
PB: predicated region body
PF: predicated region fallthrough
CT: control target
= control target key end

     0   :  { %s1107_s26 = smov 32   ;;  %vm62_vm0 = vcmask 261120   ;;  %vm263_vm1 = vcmask 523264   ;;  %vm764_vm2 = vcmask 785408   ;;  %s2057_s3 = inlined_call_operand.vmem [shape: f32[32,160], index: 3, kind: input, shape index: {}]   ;;  %s2058_s1 = inlined_call_operand.vmem [shape: f32[32,160], index: 1, kind: input, shape index: {}]   ;;  %s2059_s0 = inlined_call_operand.vmem [shape: f32[32,32], index: 0, kind: input, shape index: {}]   ;;  %s2060_s5 = inlined_call_operand.vmem [shape: f32[320,160], index: 5, kind: input, shape index: {}]   ;;  %s2061_s4 = inlined_call_operand.vmem [shape: f32[1,160], index: 4, kind: input, shape index: {}]   ;;  %s2062_s7 = inlined_call_operand.vmem [shape: f32[160,320], index: 7, kind: input, shape index: {}]   ;;  %s2063_s6 = inlined_call_operand.vmem [shape: f32[1,160], index: 6, kind: input, shape index: {}]   ;;  %s2064_s13 = inlined_call_operand.vmem [shape: f32[32,768], index: 13, kind: output, shape index: {}]   ;;  %s2065_s8 = inlined_call_operand.vmem [shape: f32[1,320], index: 8, kind: input, shape index: {}]   ;;  %s2066_s9 = inlined_call_operand.vmem [shape: f32[128,32], index: 9, kind: input, shape index: {}]   ;;  %s2067_s2 = inlined_call_operand.vmem [shape: f32[32,160], index: 2, kind: input, shape index: {}]   ;;  %s2068_s10 = inlined_call_operand.vmem [shape: f32[1,32], index: 10, kind: input, shape index: {}]   ;;  %s2069_s12 = inlined_call_operand.vmem [shape: f32[1,128], index: 12, kind: input, shape index: {}]   ;;  %s2070_s11 = inlined_call_operand.vmem [shape: f32[32,128], index: 11, kind: input, shape index: {}]  }
   0x1   :  { %v54_v0 = vld [vmem:[%s2057_s3 + $0x30] sm:$0xff]  ;;  %v55_v1 = vld [vmem:[%s2057_s3 + $0x38] sm:$0xff]  ;;  %v52_v2 = vld [vmem:[%s2057_s3 + $0x20] sm:$0xff] }
   0x2   :  { %87 = vmatpush.msra.mxu0 %v54_v0  ;;  %116 = vmatpush.msra.mxu1 %v55_v1  ;;  %v53_v3 = vld [vmem:[%s2057_s3 + $0x28] sm:$0xff]  ;;  %v50_v4 = vld [vmem:[%s2057_s3 + $0x10] sm:$0xff]  ;;  %v51_v5 = vld [vmem:[%s2057_s3 + $0x18] sm:$0xff] }
   0x3   :  { %v133_v6 = vld [vmem:[%s2058_s1] sm:$0xff]  ;;  %v49_v8 = vld [vmem:[%s2057_s3 + $0x8] sm:$0xff]  ;;  %v207_v12 = vld [vmem:[%s2060_s5 + $0xf0] sm:$0xff] }
   0x4   :  { %88 = vmatpush.msra.mxu0 %v52_v2  ;;  %117 = vmatpush.msra.mxu1 %v53_v3  ;;  %v48_v7 = vld [vmem:[%s2057_s3] sm:$0xff]  ;;  %v134_v11 = vld [vmem:[%s2058_s1 + $0x8] sm:$0xff]  ;;  %v208_v13 = vld [vmem:[%s2060_s5 + $0xf8] sm:$0xff] }
   0x5   :  { %149 = vrot.lane.b32.xlu0 %v133_v6, %s1107_s26  ;;  %v137_v9 = vld [vmem:[%s2058_s1 + $0x20] sm:$0xff]  ;;  %v239_v14 = vld [vmem:[%s2060_s5 + $0x1f0] sm:$0xff]  ;;  %151 = vrot.lane.b32.xlu2 %v134_v11, %s1107_s26 }
   0x6   :  { %89 = vmatpush.msra.mxu0 %v50_v4  ;;  %118 = vmatpush.msra.mxu1 %v51_v5  ;;  %v44_v10 = vld [vmem:[%s2059_s0] sm:$0xff]  ;;  %v135_v16 = vld [vmem:[%s2058_s1 + $0x10] sm:$0xff]  ;;  %v206_v17 = vld [vmem:[%s2060_s5 + $0xe8] sm:$0xff] }
   0x7   :  { %157 = vrot.lane.b32.xlu1 %v137_v9, %s1107_s26  ;;  %v205_v15 = vld [vmem:[%s2060_s5 + $0xe0] sm:$0xff]  ;;  %272 = vmatpush.msra.mxu2 %v207_v12  ;;  %v203_v19 = vld [vmem:[%s2060_s5 + $0xd0] sm:$0xff]  ;;  %v204_v21 = vld [vmem:[%s2060_s5 + $0xd8] sm:$0xff] }
   0x8   :  { %90 = vmatpush.msra.mxu0 %v48_v7  ;;  %119 = vmatpush.msra.mxu1 %v49_v8  ;;  %v237_v18 = vld [vmem:[%s2060_s5 + $0x1e0] sm:$0xff]  ;;  %v139_v20 = vld [vmem:[%s2058_s1 + $0x30] sm:$0xff]  ;;  %v45_v24 = vld [vmem:[%s2059_s0 + $0x8] sm:$0xff] }
   0x9   :  { %1031 = vmatmul.msk.f32.vlgmr.msra.gmra.mxu0 %vm62_vm0, %v44_v10  ;;  %1035 = vmatmul.msk.f32.vlgmr.msra.gmra.mxu1 %vm62_vm0, %v44_v10  ;;  %v235_v22 = vld [vmem:[%s2060_s5 + $0x1d0] sm:$0xff]  ;;  %v201_v23 = vld [vmem:[%s2060_s5 + $0xc0] sm:$0xff]  ;;  %v136_v25 = vld [vmem:[%s2058_s1 + $0x18] sm:$0xff] }
   0xa   :  { %359 = vmatpush.msrb.mxu1 %v208_v13  ;;  %301 = vmatpush.msra.mxu3 %v239_v14  ;;  %v202_v26 = vld [vmem:[%s2060_s5 + $0xc8] sm:$0xff]  ;;  %v233_v27 = vld [vmem:[%s2060_s5 + $0x1c0] sm:$0xff]  ;;  %v199_v28 = vld [vmem:[%s2060_s5 + $0xb0] sm:$0xff] }
   0xb   :  { %273 = vmatpush.msra.mxu2 %v205_v15  ;;  %v200_v29 = vld [vmem:[%s2060_s5 + $0xb8] sm:$0xff]  ;;  %v138_v30 = vld [vmem:[%s2058_s1 + $0x28] sm:$0xff]  ;;  %v231_v31 = vld [vmem:[%s2060_s5 + $0x1b0] sm:$0xff] }
   0xc   :  { %360 = vmatpush.msrb.mxu1 %v206_v17  ;;  %302 = vmatpush.msra.mxu3 %v237_v18  ;;  %v197_v32 = vld [vmem:[%s2060_s5 + $0xa0] sm:$0xff]  ;;  %v198_v33 = vld [vmem:[%s2060_s5 + $0xa8] sm:$0xff]  ;;  %v140_v34 = vld [vmem:[%s2058_s1 + $0x38] sm:$0xff] }
   0xd   :  { %153 = vrot.lane.b32.xlu0 %v135_v16, %s1107_s26  ;;  %274 = vmatpush.msra.mxu2 %v203_v19  ;;  %v229_v35 = vld [vmem:[%s2060_s5 + $0x1a0] sm:$0xff]  ;;  %v195_v36 = vld [vmem:[%s2060_s5 + $0x90] sm:$0xff]  ;;  %v196_v37 = vld [vmem:[%s2060_s5 + $0x98] sm:$0xff] }
   0xe   :  { %361 = vmatpush.msrb.mxu1 %v204_v21  ;;  %303 = vmatpush.msra.mxu3 %v235_v22  ;;  %v46_v38 = vld [vmem:[%s2059_s0 + $0x10] sm:$0xff]  ;;  %v193_v40 = vld [vmem:[%s2060_s5 + $0x80] sm:$0xff]  ;;  %v194_v41 = vld [vmem:[%s2060_s5 + $0x88] sm:$0xff] }
   0xf   :  { %161 = vrot.lane.b32.xlu1 %v139_v20, %s1107_s26  ;;  %275 = vmatpush.msra.mxu2 %v201_v23  ;;  %v227_v39 = vld [vmem:[%s2060_s5 + $0x190] sm:$0xff]  ;;  %v225_v43 = vld [vmem:[%s2060_s5 + $0x180] sm:$0xff]  ;;  %v192_v45 = vld [vmem:[%s2060_s5 + $0x78] sm:$0xff] }
  0x10   :  { %155 = vrot.lane.b32.xlu2 %v136_v25, %s1107_s26  ;;  %362 = vmatpush.msrb.mxu1 %v202_v26  ;;  %v255_v42 = vld [vmem:[%s2060_s5 + $0x270] sm:$0xff]  ;;  %v189_v47 = vld [vmem:[%s2060_s5 + $0x60] sm:$0xff]  ;;  %v190_v48 = vld [vmem:[%s2060_s5 + $0x68] sm:$0xff] }
  0x11   :  { %1032 = vmatmul.msk.f32.gmra.mxu0 %vm62_vm0, %v45_v24  ;;  %1036 = vmatmul.msk.f32.gmra.mxu1 %vm62_vm0, %v45_v24  ;;  %v191_v44 = vld [vmem:[%s2060_s5 + $0x70] sm:$0xff]  ;;  %v221_v49 = vld [vmem:[%s2060_s5 + $0x160] sm:$0xff]  ;;  %v47_v51 = vld [vmem:[%s2059_s0 + $0x18] sm:$0xff] }
  0x12   :  { %304 = vmatpush.msra.mxu3 %v233_v27  ;;  %276 = vmatpush.msra.mxu2 %v199_v28  ;;  %v223_v46 = vld [vmem:[%s2060_s5 + $0x170] sm:$0xff]  ;;  %v188_v52 = vld [vmem:[%s2060_s5 + $0x58] sm:$0xff]  ;;  %v185_v54 = vld [vmem:[%s2060_s5 + $0x40] sm:$0xff] }
  0x13   :  { %363 = vmatpush.msrb.mxu1 %v200_v29  ;;  %338 = vmatpush.msrb.mxu0 %v255_v42  ;;  %v187_v50 = vld [vmem:[%s2060_s5 + $0x50] sm:$0xff]  ;;  %v186_v55 = vld [vmem:[%s2060_s5 + $0x48] sm:$0xff]  ;;  %v217_v56 = vld [vmem:[%s2060_s5 + $0x140] sm:$0xff] }
  0x14   :  { %305 = vmatpush.msra.mxu3 %v231_v31  ;;  %277 = vmatpush.msra.mxu2 %v197_v32  ;;  %v219_v53 = vld [vmem:[%s2060_s5 + $0x150] sm:$0xff]  ;;  %v184_v58 = vld [vmem:[%s2060_s5 + $0x38] sm:$0xff]  ;;  %v181_v60 = vld [vmem:[%s2060_s5 + $0x20] sm:$0xff] }
  0x15   :  { %159 = vrot.lane.b32.xlu0 %v138_v30, %s1107_s26  ;;  %364 = vmatpush.msrb.mxu1 %v198_v33  ;;  %v183_v57 = vld [vmem:[%s2060_s5 + $0x30] sm:$0xff]  ;;  %v182_v61 = vld [vmem:[%s2060_s5 + $0x28] sm:$0xff]  ;;  %v213_v62 = vld [vmem:[%s2060_s5 + $0x120] sm:$0xff] }
  0x16   :  { %306 = vmatpush.msra.mxu3 %v229_v35  ;;  %278 = vmatpush.msra.mxu2 %v195_v36  ;;  %v215_v59 = vld [vmem:[%s2060_s5 + $0x130] sm:$0xff]  ;;  %v253_v0 = vld [vmem:[%s2060_s5 + $0x260] sm:$0xff]  ;;  %v180_v1 = vld [vmem:[%s2060_s5 + $0x18] sm:$0xff] }
  0x17   :  { %163 = vrot.lane.b32.xlu1 %v140_v34, %s1107_s26  ;;  %365 = vmatpush.msrb.mxu1 %v196_v37  ;;  %v179_v63 = vld [vmem:[%s2060_s5 + $0x10] sm:$0xff]  ;;  %v177_v3 = vld [vmem:[%s2060_s5] sm:$0xff]  ;;  %v178_v5 = vld [vmem:[%s2060_s5 + $0x8] sm:$0xff] }
  0x18   :  { %307 = vmatpush.msra.mxu3 %v227_v39  ;;  %279 = vmatpush.msra.mxu2 %v193_v40  ;;  %v211_v2 = vld [vmem:[%s2060_s5 + $0x110] sm:$0xff]  ;;  %v209_v6 = vld [vmem:[%s2060_s5 + $0x100] sm:$0xff]  ;;  %v240_v7 = vld [vmem:[%s2060_s5 + $0x1f8] sm:$0xff] }
  0x19   :  { %1033 = vmatmul.msk.f32.gmra.mxu0 %vm62_vm0, %v46_v38  ;;  %1037 = vmatmul.msk.f32.gmra.mxu1 %vm62_vm0, %v46_v38  ;;  %v251_v4 = vld [vmem:[%s2060_s5 + $0x250] sm:$0xff]  ;;  %v249_v8 = vld [vmem:[%s2060_s5 + $0x240] sm:$0xff]  ;;  %v238_v9 = vld [vmem:[%s2060_s5 + $0x1e8] sm:$0xff] }
  0x1a   :  { %366 = vmatpush.msrb.mxu1 %v194_v41  ;;  %308 = vmatpush.msra.mxu3 %v225_v43  ;;  %v247_v10 = vld [vmem:[%s2060_s5 + $0x230] sm:$0xff]  ;;  %v236_v11 = vld [vmem:[%s2060_s5 + $0x1d8] sm:$0xff]  ;;  %v245_v12 = vld [vmem:[%s2060_s5 + $0x220] sm:$0xff] }
  0x1b   :  { %280 = vmatpush.msra.mxu2 %v191_v44  ;;  %339 = vmatpush.msrb.mxu0 %v253_v0  ;;  %v234_v13 = vld [vmem:[%s2060_s5 + $0x1c8] sm:$0xff]  ;;  %v243_v14 = vld [vmem:[%s2060_s5 + $0x210] sm:$0xff]  ;;  %v232_v15 = vld [vmem:[%s2060_s5 + $0x1b8] sm:$0xff] }
  0x1c   :  { %367 = vmatpush.msrb.mxu1 %v192_v45  ;;  %309 = vmatpush.msra.mxu3 %v223_v46  ;;  %v256_v16 = vld [vmem:[%s2060_s5 + $0x278] sm:$0xff]  ;;  %v241_v17 = vld [vmem:[%s2060_s5 + $0x200] sm:$0xff]  ;;  %v230_v18 = vld [vmem:[%s2060_s5 + $0x1a8] sm:$0xff] }
  0x1d   :  { %281 = vmatpush.msra.mxu2 %v189_v47  ;;  %340 = vmatpush.msrb.mxu0 %v251_v4  ;;  %v254_v19 = vld [vmem:[%s2060_s5 + $0x268] sm:$0xff]  ;;  %v228_v21 = vld [vmem:[%s2060_s5 + $0x198] sm:$0xff]  ;;  %v56_v35 = vld [vmem:[%s2061_s4] sm:$0x3] }
  0x1e   :  { %368 = vmatpush.msrb.mxu1 %v190_v48  ;;  %310 = vmatpush.msra.mxu3 %v221_v49  ;;  %v226_v23 = vld [vmem:[%s2060_s5 + $0x188] sm:$0xff]  ;;  %v224_v24 = vld [vmem:[%s2060_s5 + $0x178] sm:$0xff]  ;;  %v58_v41 = vperm.slane %v56_v35, 0  ;;  %v59_v42 = vperm.slane %v56_v35, 1 }
  0x1f   :  { %282 = vmatpush.msra.mxu2 %v187_v50  ;;  %341 = vmatpush.msrb.mxu0 %v249_v8  ;;  %v252_v27 = vld [vmem:[%s2060_s5 + $0x258] sm:$0xff]  ;;  %v222_v28 = vld [vmem:[%s2060_s5 + $0x168] sm:$0xff]  ;;  %v500_v8 = vld [vmem:[%s2062_s7 + $0x170] sm:$0xff] }
  0x20   :  { %369 = vmatpush.msrb.mxu1 %v188_v52  ;;  %311 = vmatpush.msra.mxu3 %v219_v53  ;;  %v250_v29 = vld [vmem:[%s2060_s5 + $0x248] sm:$0xff]  ;;  %v220_v30 = vld [vmem:[%s2060_s5 + $0x158] sm:$0xff] }
  0x21   :  { %1034 = vmatmul.msk.f32.gmra.mxu0 %vm62_vm0, %v47_v51  ;;  %1038 = vmatmul.msk.f32.gmra.mxu1 %vm62_vm0, %v47_v51  ;;  %v218_v33 = vld [vmem:[%s2060_s5 + $0x148] sm:$0xff]  ;;  %v216_v34 = vld [vmem:[%s2060_s5 + $0x138] sm:$0xff] }
  0x22   :  { %283 = vmatpush.msra.mxu2 %v185_v54  ;;  %370 = vmatpush.msrb.mxu1 %v186_v55  ;;  %v248_v37 = vld [vmem:[%s2060_s5 + $0x238] sm:$0xff]  ;;  %v214_v39 = vld [vmem:[%s2060_s5 + $0x128] sm:$0xff] }
  0x23   :  { %312 = vmatpush.msra.mxu3 %v217_v56  ;;  %342 = vmatpush.msrb.mxu0 %v247_v10  ;;  %v246_v40 = vld [vmem:[%s2060_s5 + $0x228] sm:$0xff]  ;;  %v212_v43 = vld [vmem:[%s2060_s5 + $0x118] sm:$0xff] }
  0x24   :  { %284 = vmatpush.msra.mxu2 %v183_v57  ;;  %371 = vmatpush.msrb.mxu1 %v184_v58  ;;  %v244_v44 = vld [vmem:[%s2060_s5 + $0x218] sm:$0xff]  ;;  %v210_v45 = vld [vmem:[%s2060_s5 + $0x108] sm:$0xff] }
  0x25   :  { %313 = vmatpush.msra.mxu3 %v215_v59  ;;  %343 = vmatpush.msrb.mxu0 %v245_v12  ;;  %v242_v46 = vld [vmem:[%s2060_s5 + $0x208] sm:$0xff]  ;;  %v497_v10 = vld [vmem:[%s2062_s7 + $0x158] sm:$0xff]  ;;  %v494_v12 = vld [vmem:[%s2062_s7 + $0x140] sm:$0xff] }
  0x26   :  { %285 = vmatpush.msra.mxu2 %v181_v60  ;;  %372 = vmatpush.msrb.mxu1 %v182_v61  ;;  %v457_v35 = vld [vmem:[%s2062_s7 + $0x18] sm:$0xff] }
  0x27   :  { %314 = vmatpush.msra.mxu3 %v213_v62  ;;  %344 = vmatpush.msrb.mxu0 %v243_v14  ;;  %v491_v14 = vld [vmem:[%s2062_s7 + $0x128] sm:$0xff] }
  0x28   :  { %286 = vmatpush.msra.mxu2 %v179_v63  ;;  %373 = vmatpush.msrb.mxu1 %v180_v1 }
  0x29   :  { %315 = vmatpush.msra.mxu3 %v211_v2  ;;  %345 = vmatpush.msrb.mxu0 %v241_v17  ;;  %v484_v17 = vld [vmem:[%s2062_s7 + $0xf0] sm:$0xff] }
  0x2a   :  { %287 = vmatpush.msra.mxu2 %v177_v3  ;;  %374 = vmatpush.msrb.mxu1 %v178_v5 }
  0x2b   :  { %316 = vmatpush.msra.mxu3 %v209_v6 }
  0x2c   :  { %388 = vmatpush.msrb.mxu2 %v240_v7  ;;  %425 = vmatpush.msra.mxu1 %v256_v16  ;;  %v499_v7 = vld [vmem:[%s2062_s7 + $0x168] sm:$0xff] }
  0x2d   :  { %1063 = vmatpush.msrb.mxu3 %v256_v16  ;;  %534 = vmatpush.msra.mxu0 %v499_v7  ;;  %v488_v16 = vld [vmem:[%s2062_s7 + $0x110] sm:$0xff]  ;;  %v459_v7 = vld [vmem:[%s2062_s7 + $0x28] sm:$0xff] }
  0x2e   :  { %389 = vmatpush.msrb.mxu2 %v238_v9  ;;  %426 = vmatpush.msra.mxu1 %v254_v19  ;;  %v496_v9 = vld [vmem:[%s2062_s7 + $0x150] sm:$0xff] }
  0x2f   :  { %1064 = vmatpush.msrb.mxu3 %v254_v19  ;;  %535 = vmatpush.msra.mxu0 %v496_v9  ;;  %v481_v19 = vld [vmem:[%s2062_s7 + $0xd8] sm:$0xff] }
  0x30   :  { %390 = vmatpush.msrb.mxu2 %v236_v11  ;;  %427 = vmatpush.msra.mxu1 %v252_v27  ;;  %v493_v11 = vld [vmem:[%s2062_s7 + $0x138] sm:$0xff] }
  0x31   :  { %1065 = vmatpush.msrb.mxu3 %v252_v27  ;;  %536 = vmatpush.msra.mxu0 %v493_v11  ;;  %v469_v27 = vld [vmem:[%s2062_s7 + $0x78] sm:$0xff]  ;;  %v456_v11 = vld [vmem:[%s2062_s7 + $0x10] sm:$0xff] }
  0x32   :  { %391 = vmatpush.msrb.mxu2 %v234_v13  ;;  %428 = vmatpush.msra.mxu1 %v250_v29  ;;  %v490_v13 = vld [vmem:[%s2062_s7 + $0x120] sm:$0xff] }
  0x33   :  { %1066 = vmatpush.msrb.mxu3 %v250_v29  ;;  %537 = vmatpush.msra.mxu0 %v490_v13  ;;  %v466_v29 = vld [vmem:[%s2062_s7 + $0x60] sm:$0xff] }
  0x34   :  { %392 = vmatpush.msrb.mxu2 %v232_v15  ;;  %429 = vmatpush.msra.mxu1 %v248_v37  ;;  %v487_v15 = vld [vmem:[%s2062_s7 + $0x108] sm:$0xff] }
  0x35   :  { %1067 = vmatpush.msrb.mxu3 %v248_v37  ;;  %538 = vmatpush.msra.mxu0 %v487_v15  ;;  %v454_v37 = vld [vmem:[%s2062_s7] sm:$0xff] }
  0x36   :  { %393 = vmatpush.msrb.mxu2 %v230_v18  ;;  %430 = vmatpush.msra.mxu1 %v246_v40  ;;  %v485_v18 = vld [vmem:[%s2062_s7 + $0xf8] sm:$0xff] }
  0x37   :  { %1068 = vmatpush.msrb.mxu3 %v246_v40  ;;  %539 = vmatpush.msra.mxu0 %v484_v17  ;;  %v498_v40 = vld [vmem:[%s2062_s7 + $0x160] sm:$0xff] }
  0x38   :  { %394 = vmatpush.msrb.mxu2 %v228_v21  ;;  %431 = vmatpush.msra.mxu1 %v244_v44  ;;  %v478_v21 = vld [vmem:[%s2062_s7 + $0xc0] sm:$0xff] }
  0x39   :  { %1069 = vmatpush.msrb.mxu3 %v244_v44  ;;  %540 = vmatpush.msra.mxu0 %v481_v19  ;;  %v486_v44 = vld [vmem:[%s2062_s7 + $0x100] sm:$0xff] }
  0x3a   :  { %395 = vmatpush.msrb.mxu2 %v226_v23  ;;  %432 = vmatpush.msra.mxu1 %v242_v46  ;;  %v475_v23 = vld [vmem:[%s2062_s7 + $0xa8] sm:$0xff]  ;;  %v510_v19 = vld [vmem:[%s2062_s7 + $0x1c0] sm:$0xff] }
  0x3b   :  { %1070 = vmatpush.msrb.mxu3 %v242_v46  ;;  %541 = vmatpush.msra.mxu0 %v478_v21  ;;  %v480_v46 = vld [vmem:[%s2062_s7 + $0xd0] sm:$0xff] }
  0x3c   :  { %396 = vmatpush.msrb.mxu2 %v224_v24  ;;  %v476_v24 = vld [vmem:[%s2062_s7 + $0xb0] sm:$0xff] }
  0x3d   :  { %542 = vmatpush.msra.mxu0 %v475_v23 }
  0x3e   :  { %397 = vmatpush.msrb.mxu2 %v222_v28  ;;  %v470_v28 = vld [vmem:[%s2062_s7 + $0x80] sm:$0xff] }
  0x40   :  { %398 = vmatpush.msrb.mxu2 %v220_v30  ;;  %v467_v30 = vld [vmem:[%s2062_s7 + $0x68] sm:$0xff] }
  0x42   :  { %399 = vmatpush.msrb.mxu2 %v218_v33  ;;  %v460_v33 = vld [vmem:[%s2062_s7 + $0x30] sm:$0xff] }
  0x44   :  { %400 = vmatpush.msrb.mxu2 %v216_v34  ;;  %v461_v34 = vld [vmem:[%s2062_s7 + $0x38] sm:$0xff] }
  0x46   :  { %401 = vmatpush.msrb.mxu2 %v214_v39  ;;  %v501_v39 = vld [vmem:[%s2062_s7 + $0x178] sm:$0xff] }
  0x48   :  { %402 = vmatpush.msrb.mxu2 %v212_v43  ;;  %v489_v43 = vld [vmem:[%s2062_s7 + $0x118] sm:$0xff] }
  0x4a   :  { %403 = vmatpush.msrb.mxu2 %v210_v45  ;;  %v483_v45 = vld [vmem:[%s2062_s7 + $0xe8] sm:$0xff] }
  0x5f   :  { %v152_v20 = vpop.permute.xlu2 %151 }
  0x6a   :  { %v156_v31 = vpop.permute.xlu2 %155 }
  0x77   :  { %v150_v22 = vpop.permute.xlu0 %149 }
  0x78   :  { %v1457_v25 = vsel %vm62_vm0, %v150_v22, %v152_v20  ;;  %v482_v20 = vld [vmem:[%s2062_s7 + $0xe0] sm:$0xff] }
  0x79   :  { %1039 = vmatmul.msk.f32.vlgmr.msrb.gmra.mxu0 %vm263_vm1, %v1457_v25  ;;  %v1461_v26 = vpop.permute.xlu1 %157 }
  0x7f   :  { %v154_v32 = vpop.permute.xlu0 %153 }
  0x80   :  { %v1485_v36 = vsel %vm62_vm0, %v154_v32, %v156_v31  ;;  %v463_v31 = vld [vmem:[%s2062_s7 + $0x48] sm:$0xff] }
  0x81   :  { %1040 = vmatmul.msk.f32.gmra.mxu0 %vm263_vm1, %v1485_v36  ;;  %v162_v38 = vpop.permute.xlu1 %161 }
  0x86   :  { %v92_v47 = vpop.f32.mrf.mxu0  ;;  %v121_v48 = vpop.f32.mrf.mxu1 }
  0x87   :  { %v93_v49 = vadd.f32 %v92_v47, %v58_v41  ;;  %v122_v50 = vadd.f32 %v121_v48, %v59_v42  ;;  %v160_v51 = vpop.permute.xlu0 %159  ;;  %v477_v47 = vld [vmem:[%s2062_s7 + $0xb8] sm:$0xff] }
  0x88   :  { %v1512_v52 = vsel %vm62_vm0, %v1461_v26, %v160_v51 }
  0x89   :  { %288 = vmatmul.f32.vlgmr.msra.gmra.mxu2 %v93_v49  ;;  %375 = vmatmul.f32.vlgmr.msrb.gmra.mxu1 %v93_v49  ;;  %v173_v53 = vsel %vm62_vm0, %v122_v50, %v150_v22  ;;  %v164_v54 = vpop.permute.xlu1 %163  ;;  %v479_v22 = vld [vmem:[%s2062_s7 + $0xc8] sm:$0xff]  ;;  %v474_v49 = vld [vmem:[%s2062_s7 + $0xa0] sm:$0xff] }
  0x8a   :  { %317 = vmatmul.f32.vlgmr.msra.gmra.mxu3 %v173_v53  ;;  %1041 = vmatmul.msk.f32.gmra.mxu0 %vm263_vm1, %v1512_v52  ;;  %v168_v59 = vsel %vm62_vm0, %v162_v38, %v164_v54  ;;  %v1661_v50 = vld [vmem:[%s2063_s6] sm:$0x3]  ;;  %v511_v54 = vld [vmem:[%s2062_s7 + $0x1c8] sm:$0xff] }
  0x8b   :  { %592 = vmatpush.msra.mxu2 %v500_v8  ;;  %575 = vmatpush.msrb.mxu1 %v511_v54 }
  0x8d   :  { %593 = vmatpush.msra.mxu2 %v497_v10  ;;  %v513_v10 = vld [vmem:[%s2062_s7 + $0x1d8] sm:$0xff] }
  0x8e   :  { %v95_v55 = vpop.f32.mrf.mxu0  ;;  %v124_v56 = vpop.f32.mrf.mxu1 }
  0x8f   :  { %v96_v57 = vadd.f32 %v95_v55, %v58_v41  ;;  %v125_v58 = vadd.f32 %v124_v56, %v59_v42  ;;  %594 = vmatpush.msra.mxu2 %v494_v12  ;;  %v512_v55 = vld [vmem:[%s2062_s7 + $0x1d0] sm:$0xff] }
  0x90   :  { %v468_v56 = vld [vmem:[%s2062_s7 + $0x70] sm:$0xff]  ;;  %633 = vmatpush.msra.mxu3 %v512_v55 }
  0x91   :  { %291 = vmatmul.f32.gmra.mxu2 %v96_v57  ;;  %378 = vmatmul.f32.gmra.mxu1 %v96_v57  ;;  %v174_v60 = vsel %vm62_vm0, %v125_v58, %v154_v32  ;;  %v464_v32 = vld [vmem:[%s2062_s7 + $0x50] sm:$0xff] }
  0x92   :  { %320 = vmatmul.f32.gmra.mxu3 %v174_v60  ;;  %1042 = vmatmul.msk.f32.gmra.mxu0 %vm263_vm1, %v168_v59 }
  0x93   :  { %595 = vmatpush.msra.mxu2 %v491_v14 }
  0x95   :  { %596 = vmatpush.msra.mxu2 %v488_v16 }
  0x96   :  { %v98_v61 = vpop.f32.mrf.mxu0  ;;  %v127_v62 = vpop.f32.mrf.mxu1 }
  0x97   :  { %v99_v63 = vadd.f32 %v98_v61, %v58_v41  ;;  %v128_v0 = vadd.f32 %v127_v62, %v59_v42  ;;  %597 = vmatpush.msra.mxu2 %v485_v18  ;;  %v509_v61 = vld [vmem:[%s2062_s7 + $0x1b8] sm:$0xff] }
  0x98   :  { %v465_v62 = vld [vmem:[%s2062_s7 + $0x58] sm:$0xff]  ;;  %634 = vmatpush.msra.mxu3 %v509_v61 }
  0x99   :  { %294 = vmatmul.f32.gmra.mxu2 %v99_v63  ;;  %381 = vmatmul.f32.gmra.mxu1 %v99_v63  ;;  %v175_v1 = vsel %vm62_vm0, %v128_v0, %v1461_v26  ;;  %v473_v26 = vld [vmem:[%s2062_s7 + $0x98] sm:$0xff] }
  0x9a   :  { %323 = vmatmul.f32.gmra.mxu3 %v175_v1  ;;  %598 = vmatpush.msra.mxu2 %v482_v20  ;;  %v505_v0 = vld [vmem:[%s2062_s7 + $0x198] sm:$0xff] }
  0x9c   :  { %599 = vmatpush.msra.mxu2 %v479_v22 }
  0x9e   :  { %v101_v2 = vpop.f32.mrf.mxu0  ;;  %v130_v3 = vpop.f32.mrf.mxu1  ;;  %600 = vmatpush.msra.mxu2 %v476_v24 }
  0x9f   :  { %v102_v4 = vadd.f32 %v101_v2, %v58_v41  ;;  %v131_v5 = vadd.f32 %v130_v3, %v59_v42  ;;  %v495_v41 = vld [vmem:[%s2062_s7 + $0x148] sm:$0xff]  ;;  %v492_v42 = vld [vmem:[%s2062_s7 + $0x130] sm:$0xff]  ;;  %v462_v2 = vld [vmem:[%s2062_s7 + $0x40] sm:$0xff] }
  0xa0   :  { %601 = vmatpush.msra.mxu2 %v473_v26 }
  0xa1   :  { %297 = vmatmul.f32.gmra.mxu2 %v102_v4  ;;  %384 = vmatmul.f32.gmra.mxu1 %v102_v4  ;;  %v176_v6 = vsel %vm62_vm0, %v131_v5, %v162_v38  ;;  %v455_v38 = vld [vmem:[%s2062_s7 + $0x8] sm:$0xff]  ;;  %v502_v5 = vld [vmem:[%s2062_s7 + $0x180] sm:$0xff] }
  0xa2   :  { %326 = vmatmul.f32.gmra.mxu3 %v176_v6  ;;  %602 = vmatpush.msra.mxu2 %v470_v28 }
  0xa4   :  { %603 = vmatpush.msra.mxu2 %v467_v30 }
  0xa6   :  { %604 = vmatpush.msra.mxu2 %v464_v32 }
  0xa8   :  { %605 = vmatpush.msra.mxu2 %v461_v34 }
  0xa9   :  { %404 = vmatmul.f32.vlgmr.msrb.gmra.mxu2 %v173_v53  ;;  %1043 = vmatmul.msk.f32.vlgmr.msra.gmra.mxu1 %vm263_vm1, %v1457_v25  ;;  %v472_v25 = vld [vmem:[%s2062_s7 + $0x90] sm:$0xff]  ;;  %v471_v53 = vld [vmem:[%s2062_s7 + $0x88] sm:$0xff] }
  0xaa   :  { %1044 = vmatmul.msk.f32.vlgmr.msrb.gmra.mxu3 %vm263_vm1, %v1485_v36  ;;  %543 = vmatpush.msra.mxu0 %v472_v25  ;;  %v458_v36 = vld [vmem:[%s2062_s7 + $0x20] sm:$0xff] }
  0xab   :  { %606 = vmatpush.msra.mxu2 %v458_v36 }
  0xac   :  { %544 = vmatpush.msra.mxu0 %v469_v27  ;;  %v507_v27 = vld [vmem:[%s2062_s7 + $0x1a8] sm:$0xff] }
  0xad   :  { %607 = vmatpush.msra.mxu2 %v455_v38  ;;  %v504_v38 = vld [vmem:[%s2062_s7 + $0x190] sm:$0xff] }
  0xae   :  { %545 = vmatpush.msra.mxu0 %v466_v29 }
  0xb0   :  { %546 = vmatpush.msra.mxu0 %v463_v31 }
  0xb1   :  { %407 = vmatmul.f32.gmra.mxu2 %v174_v60  ;;  %v508_v60 = vld [vmem:[%s2062_s7 + $0x1b0] sm:$0xff] }
  0xb2   :  { %1045 = vmatmul.msk.f32.gmra.mxu3 %vm263_vm1, %v1512_v52  ;;  %547 = vmatpush.msra.mxu0 %v460_v33  ;;  %v1664_v52 = vperm.slane %v1661_v50, 0  ;;  %v260_v33 = vperm.slane %v1661_v50, 1 }
  0xb3   :  { %576 = vmatpush.msrb.mxu1 %v508_v60 }
  0xb4   :  { %548 = vmatpush.msra.mxu0 %v457_v35 }
  0xb5   :  { %577 = vmatpush.msrb.mxu1 %v505_v0 }
  0xb6   :  { %549 = vmatpush.msra.mxu0 %v454_v37 }
  0xb7   :  { %578 = vmatpush.msrb.mxu1 %v502_v5 }
  0xb8   :  { %650 = vmatpush.msrb.mxu0 %v501_v39 }
  0xb9   :  { %410 = vmatmul.f32.gmra.mxu2 %v175_v1  ;;  %v506_v1 = vld [vmem:[%s2062_s7 + $0x1a0] sm:$0xff]  ;;  %691 = vmatpush.msra.mxu1 %v513_v10 }
  0xba   :  { %1046 = vmatmul.msk.f32.gmra.mxu3 %vm263_vm1, %v168_v59  ;;  %651 = vmatpush.msrb.mxu0 %v498_v40 }
  0xbb   :  { %635 = vmatpush.msra.mxu3 %v506_v1  ;;  %692 = vmatpush.msra.mxu1 %v510_v19 }
  0xbc   :  { %652 = vmatpush.msrb.mxu0 %v495_v41 }
  0xbd   :  { %693 = vmatpush.msra.mxu1 %v507_v27 }
  0xbe   :  { %653 = vmatpush.msrb.mxu0 %v492_v42 }
  0xbf   :  { %694 = vmatpush.msra.mxu1 %v504_v38 }
  0xc0   :  { %654 = vmatpush.msrb.mxu0 %v489_v43 }
  0xc1   :  { %413 = vmatmul.f32.gmra.mxu2 %v176_v6  ;;  %v503_v6 = vld [vmem:[%s2062_s7 + $0x188] sm:$0xff] }
  0xc2   :  { %655 = vmatpush.msrb.mxu0 %v486_v44  ;;  %636 = vmatpush.msra.mxu3 %v503_v6 }
  0xc4   :  { %656 = vmatpush.msrb.mxu0 %v483_v45 }
  0xc6   :  { %657 = vmatpush.msrb.mxu0 %v480_v46 }
  0xc8   :  { %658 = vmatpush.msrb.mxu0 %v477_v47 }
  0xca   :  { %659 = vmatpush.msrb.mxu0 %v474_v49 }
  0xcc   :  { %660 = vmatpush.msrb.mxu0 %v471_v53 }
  0xce   :  { %661 = vmatpush.msrb.mxu0 %v468_v56 }
  0xd0   :  { %662 = vmatpush.msrb.mxu0 %v465_v62 }
  0xd2   :  { %663 = vmatpush.msrb.mxu0 %v462_v2 }
  0xd4   :  { %664 = vmatpush.msrb.mxu0 %v459_v7 }
  0xd6   :  { %665 = vmatpush.msrb.mxu0 %v456_v11 }
  0xf6   :  { %v347_v51 = vpop.f32.mrf.mxu0 }
  0xfe   :  { %v350_v8 = vpop.f32.mrf.mxu0 }
 0x106   :  { %v1653_v48 = vpop.f32.mrf.mxu1 }
 0x107   :  { %v353_v21 = vpop.f32.mrf.mxu0  ;;  %v377_v36 = vadd.f32 %v1653_v48, %v260_v33 }
 0x10c   :  { %v289_v57 = vpop.f32.mrf.mxu2 }
 0x10d   :  { %v290_v58 = vadd.f32 %v289_v57, %v1664_v52  ;;  %v318_v59 = vpop.f32.mrf.mxu3 }
 0x10e   :  { %v1697_v3 = vpop.f32.mrf.mxu1 }
 0x10f   :  { %v319_v63 = vadd.f32 %v318_v59, %v290_v58  ;;  %v356_v32 = vpop.f32.mrf.mxu0  ;;  %v380_v45 = vadd.f32 %v1697_v3, %v260_v33 }
 0x111   :  { %v348_v4 = vadd.f32 %v347_v51, %v319_v63  ;;  %v514_v63 = vld [vmem:[%s2065_s8] sm:$0x7]  ;;  %s1108_s8 = smov 96  }
 0x112   :  { %v1776_v1 = vperm.slane %v514_v63, 0  ;;  %v517_v5 = vperm.slane %v514_v63, 1 }
 0x113   :  { %v446_v9 = vmax.f32 %v348_v4, 0.0 }
 0x114   :  { %v292_v12 = vpop.f32.mrf.mxu2 }
 0x115   :  { %1003 = vst [vmem:[%s2064_s13] sm:$0xff] %v446_v9  ;;  %v293_v13 = vadd.f32 %v292_v12, %v1664_v52  ;;  %v321_v14 = vpop.f32.mrf.mxu3  ;;  %550 = vmatmul.f32.vlgmr.msra.gmra.mxu0 %v446_v9  ;;  %608 = vmatmul.f32.vlgmr.msra.gmra.mxu2 %v446_v9 }
 0x116   :  { %v382_v17 = vpop.f32.mrf.mxu1 }
 0x117   :  { %v322_v15 = vadd.f32 %v321_v14, %v293_v13  ;;  %v383_v50 = vadd.f32 %v382_v17, %v260_v33 }
 0x119   :  { %v351_v16 = vadd.f32 %v350_v8, %v322_v15 }
 0x11b   :  { %v448_v18 = vmax.f32 %v351_v16, 0.0 }
 0x11c   :  { %v295_v20 = vpop.f32.mrf.mxu2 }
 0x11d   :  { %1009 = vst [vmem:[%s2064_s13 + $0x30] sm:$0xff] %v448_v18  ;;  %v296_v22 = vadd.f32 %v295_v20, %v1664_v52  ;;  %v324_v23 = vpop.f32.mrf.mxu3  ;;  %553 = vmatmul.f32.gmra.mxu0 %v448_v18  ;;  %611 = vmatmul.f32.gmra.mxu2 %v448_v18 }
 0x11e   :  { %v385_v28 = vpop.f32.mrf.mxu1 }
 0x11f   :  { %v325_v24 = vadd.f32 %v324_v23, %v296_v22  ;;  %v386_v56 = vadd.f32 %v385_v28, %v260_v33 }
 0x121   :  { %v354_v25 = vadd.f32 %v353_v21, %v325_v24 }
 0x123   :  { %v450_v26 = vmax.f32 %v354_v25, 0.0 }
 0x124   :  { %v298_v29 = vpop.f32.mrf.mxu2 }
 0x125   :  { %1015 = vst [vmem:[%s2064_s13 + $0x60] sm:$0xff] %v450_v26  ;;  %v299_v30 = vadd.f32 %v298_v29, %v1664_v52  ;;  %v327_v31 = vpop.f32.mrf.mxu3  ;;  %556 = vmatmul.f32.gmra.mxu0 %v450_v26  ;;  %614 = vmatmul.f32.gmra.mxu2 %v450_v26  ;;  %v518_v29 = vperm.slane %v514_v63, 2 }
 0x126   :  { %v434_v41 = vpop.f32.mrf.mxu1 }
 0x127   :  { %v328_v34 = vadd.f32 %v327_v31, %v299_v30 }
 0x129   :  { %v357_v35 = vadd.f32 %v356_v32, %v328_v34 }
 0x12b   :  { %v452_v37 = vmax.f32 %v357_v35, 0.0 }
 0x12c   :  { %v405_v39 = vpop.f32.mrf.mxu2 }
 0x12d   :  { %1021 = vst [vmem:[%s2064_s13 + $0x90] sm:$0xff] %v452_v37  ;;  %v406_v40 = vadd.f32 %v405_v39, %v377_v36  ;;  %559 = vmatmul.f32.gmra.mxu0 %v452_v37  ;;  %617 = vmatmul.f32.gmra.mxu2 %v452_v37  ;;  %v437_v44 = vpop.f32.mrf.mxu3 }
 0x12f   :  { %v435_v42 = vadd.f32 %v434_v41, %v406_v40 }
 0x131   :  { %v1740_v43 = vmax.f32 %v435_v42, 0.0 }
 0x133   :  { %1047 = vmatmul.msk.f32.vlgmr.msrb.gmra.mxu1 %vm62_vm0, %v1740_v43  ;;  %1051 = vmatmul.msk.f32.vlgmr.msra.gmra.mxu3 %vm62_vm0, %v1740_v43 }
 0x134   :  { %v408_v46 = vpop.f32.mrf.mxu2 }
 0x135   :  { %v409_v47 = vadd.f32 %v408_v46, %v380_v45  ;;  %666 = vmatmul.f32.vlgmr.msrb.gmra.mxu0 %v446_v9  ;;  %v440_v51 = vpop.f32.mrf.mxu3 }
 0x137   :  { %v438_v48 = vadd.f32 %v437_v44, %v409_v47 }
 0x139   :  { %v1747_v49 = vmax.f32 %v438_v48, 0.0 }
 0x13b   :  { %1048 = vmatmul.msk.f32.gmra.mxu1 %vm62_vm0, %v1747_v49  ;;  %1052 = vmatmul.msk.f32.gmra.mxu3 %vm62_vm0, %v1747_v49 }
 0x13c   :  { %v411_v52 = vpop.f32.mrf.mxu2 }
 0x13d   :  { %v412_v53 = vadd.f32 %v411_v52, %v383_v50  ;;  %669 = vmatmul.f32.gmra.mxu0 %v448_v18  ;;  %v443_v59 = vpop.f32.mrf.mxu3 }
 0x13f   :  { %v441_v54 = vadd.f32 %v440_v51, %v412_v53 }
 0x141   :  { %v1753_v55 = vmax.f32 %v441_v54, 0.0 }
 0x143   :  { %1049 = vmatmul.msk.f32.gmra.mxu1 %vm62_vm0, %v1753_v55  ;;  %1053 = vmatmul.msk.f32.gmra.mxu3 %vm62_vm0, %v1753_v55 }
 0x144   :  { %v414_v57 = vpop.f32.mrf.mxu2 }
 0x145   :  { %v415_v58 = vadd.f32 %v414_v57, %v386_v56  ;;  %672 = vmatmul.f32.gmra.mxu0 %v450_v26 }
 0x147   :  { %v444_v60 = vadd.f32 %v443_v59, %v415_v58 }
 0x149   :  { %v1759_v61 = vmax.f32 %v444_v60, 0.0 }
 0x14b   :  { %1050 = vmatmul.msk.f32.gmra.mxu1 %vm62_vm0, %v1759_v61  ;;  %1054 = vmatmul.msk.f32.gmra.mxu3 %vm62_vm0, %v1759_v61 }
 0x14d   :  { %675 = vmatmul.f32.gmra.mxu0 %v452_v37 }
 0x153   :  { %1055 = vmatmul.msk.f32.vlgmr.msra.gmra.mxu1 %vm62_vm0, %v1740_v43 }
 0x15b   :  { %1056 = vmatmul.msk.f32.gmra.mxu1 %vm62_vm0, %v1747_v49 }
 0x163   :  { %1057 = vmatmul.msk.f32.gmra.mxu1 %vm62_vm0, %v1753_v55 }
 0x16b   :  { %1058 = vmatmul.msk.f32.gmra.mxu1 %vm62_vm0, %v1759_v61 }
 0x192   :  { %v551_v62 = vpop.f32.mrf.mxu0 }
 0x193   :  { %v552_v2 = vadd.f32 %v551_v62, %v1776_v1 }
 0x198   :  { %v609_v3 = vpop.f32.mrf.mxu2 }
 0x199   :  { %v610_v8 = vadd.f32 %v609_v3, %v517_v5 }
 0x19a   :  { %v554_v0 = vpop.f32.mrf.mxu0 }
 0x19b   :  { %v555_v10 = vadd.f32 %v554_v0, %v1776_v1 }
 0x1a0   :  { %v612_v15 = vpop.f32.mrf.mxu2 }
 0x1a1   :  { %v613_v18 = vadd.f32 %v612_v15, %v517_v5 }
 0x1a2   :  { %v1781_v7 = vpop.f32.mrf.mxu0 }
 0x1a3   :  { %v558_v15 = vadd.f32 %v1781_v7, %v1776_v1  ;;  %v806_v7 = vld [vmem:[%s2066_s9 + $0x68] sm:$0xff] }
 0x1a8   :  { %v615_v28 = vpop.f32.mrf.mxu2 }
 0x1a9   :  { %v616_v32 = vadd.f32 %v615_v28, %v517_v5  ;;  %v798_v28 = vld [vmem:[%s2066_s9 + $0x28] sm:$0xff] }
 0x1aa   :  { %v1789_v17 = vpop.f32.mrf.mxu0 }
 0x1b0   :  { %v580_v4 = vpop.f32.mrf.mxu1  ;;  %v618_v38 = vpop.f32.mrf.mxu2 }
 0x1b1   :  { %v1779_v6 = vadd.f32 %v580_v4, %v552_v2  ;;  %v619_v44 = vadd.f32 %v618_v38, %v517_v5 }
 0x1b2   :  { %v667_v25 = vpop.f32.mrf.mxu0 }
 0x1b3   :  { %v668_v31 = vadd.f32 %v667_v25, %v518_v29  ;;  %v801_v25 = vld [vmem:[%s2066_s9 + $0x40] sm:$0xff] }
 0x1b6   :  { %v638_v9 = vpop.f32.mrf.mxu3 }
 0x1b7   :  { %v1784_v11 = vadd.f32 %v638_v9, %v610_v8 }
 0x1b8   :  { %v583_v12 = vpop.f32.mrf.mxu1 }
 0x1b9   :  { %v716_v13 = vmul.f32 0.5, %v1784_v11  ;;  %v1787_v14 = vadd.f32 %v583_v12, %v555_v10 }
 0x1ba   :  { %v670_v33 = vpop.f32.mrf.mxu0 }
 0x1bb   :  { %v724_v16 = vmul.f32 1.442695, %v716_v13  ;;  %v671_v41 = vadd.f32 %v670_v33, %v518_v29  ;;  %v793_v33 = vld [vmem:[%s2066_s9] sm:$0xff] }
 0x1bd   :  { %1091 = vpow2.f32 %v724_v16 }
 0x1be   :  { %v641_v19 = vpop.f32.mrf.mxu3 }
 0x1bf   :  { %v1791_v20 = vadd.f32 %v641_v19, %v613_v18  ;;  %v808_v18 = vld [vmem:[%s2066_s9 + $0x78] sm:$0xff]  ;;  %v807_v19 = vld [vmem:[%s2066_s9 + $0x70] sm:$0xff] }
 0x1c0   :  { %v1793_v21 = vpop.f32.mrf.mxu1  ;;  %1071 = vmatpush.msrb.mxu2 %v808_v18  ;;  %813 = vmatpush.msra.mxu0 %v808_v18 }
 0x1c1   :  { %v718_v22 = vmul.f32 0.5, %v1791_v20  ;;  %v1825_v16 = vadd.f32 %v1793_v21, %v558_v15  ;;  %v805_v21 = vld [vmem:[%s2066_s9 + $0x60] sm:$0xff] }
 0x1c2   :  { %v673_v47 = vpop.f32.mrf.mxu0  ;;  %1072 = vmatpush.msrb.mxu2 %v807_v19  ;;  %814 = vmatpush.msra.mxu0 %v807_v19 }
 0x1c3   :  { %v1092_v23 = vpop.eup %1091  ;;  %v728_v24 = vmul.f32 1.442695, %v718_v22  ;;  %v674_v56 = vadd.f32 %v673_v47, %v518_v29  ;;  %v561_v22 = vadd.f32 %v1789_v17, %v1776_v1  ;;  %v803_v1 = vld [vmem:[%s2066_s9 + $0x50] sm:$0xff]  ;;  %v802_v17 = vld [vmem:[%s2066_s9 + $0x48] sm:$0xff] }
 0x1c4   :  { %748 = vrot.lane.b32.xlu2 %v1092_v23, %s1108_s8  ;;  %1073 = vmatpush.msrb.mxu2 %v806_v7  ;;  %v804_v23 = vld [vmem:[%s2066_s9 + $0x58] sm:$0xff] }
 0x1c5   :  { %1093 = vpow2.f32 %v728_v24  ;;  %815 = vmatpush.msra.mxu0 %v806_v7 }
 0x1c6   :  { %v644_v30 = vpop.f32.mrf.mxu3  ;;  %1074 = vmatpush.msrb.mxu2 %v805_v21 }
 0x1c7   :  { %v1802_v36 = vadd.f32 %v644_v30, %v616_v32  ;;  %816 = vmatpush.msra.mxu0 %v805_v21  ;;  %v796_v30 = vld [vmem:[%s2066_s9 + $0x18] sm:$0xff]  ;;  %v794_v32 = vld [vmem:[%s2066_s9 + $0x8] sm:$0xff] }
 0x1c8   :  { %v1797_v26 = vpop.f32.mrf.mxu1  ;;  %1075 = vmatpush.msrb.mxu2 %v804_v23 }
 0x1c9   :  { %v720_v40 = vmul.f32 0.5, %v1802_v36  ;;  %v1851_v24 = vadd.f32 %v1797_v26, %v561_v22  ;;  %817 = vmatpush.msra.mxu0 %v804_v23  ;;  %v800_v26 = vld [vmem:[%s2066_s9 + $0x38] sm:$0xff] }
 0x1ca   :  { %v676_v63 = vpop.f32.mrf.mxu0  ;;  %1076 = vmatpush.msrb.mxu2 %v803_v1 }
 0x1cb   :  { %v1094_v27 = vpop.eup %1093  ;;  %v732_v48 = vmul.f32 1.442695, %v720_v40  ;;  %v677_v3 = vadd.f32 %v676_v63, %v518_v29  ;;  %818 = vmatpush.msra.mxu0 %v803_v1  ;;  %v797_v29 = vld [vmem:[%s2066_s9 + $0x20] sm:$0xff] }
 0x1cc   :  { %752 = vrot.lane.b32.xlu1 %v1094_v27, %s1108_s8  ;;  %1077 = vmatpush.msrb.mxu2 %v802_v17  ;;  %v799_v27 = vld [vmem:[%s2066_s9 + $0x30] sm:$0xff] }
 0x1cd   :  { %819 = vmatpush.msra.mxu0 %v802_v17 }
 0x1ce   :  { %v647_v42 = vpop.f32.mrf.mxu3  ;;  %1078 = vmatpush.msrb.mxu2 %v801_v25 }
 0x1cf   :  { %v1808_v50 = vadd.f32 %v647_v42, %v619_v44  ;;  %820 = vmatpush.msra.mxu0 %v801_v25  ;;  %v709_v44 = vld [vmem:[%s2067_s2 + $0x8] sm:$0xff] }
 0x1d0   :  { %v696_v34 = vpop.f32.mrf.mxu1  ;;  %1079 = vmatpush.msrb.mxu2 %v800_v26 }
 0x1d1   :  { %v1800_v35 = vadd.f32 %v696_v34, %v668_v31  ;;  %v722_v54 = vmul.f32 0.5, %v1808_v50  ;;  %821 = vmatpush.msra.mxu0 %v800_v26  ;;  %v795_v31 = vld [vmem:[%s2066_s9 + $0x10] sm:$0xff] }
 0x1d2   :  { %1080 = vmatpush.msrb.mxu2 %v799_v27 }
 0x1d3   :  { %v717_v37 = vmul.f32 0.5, %v1800_v35  ;;  %v736_v59 = vmul.f32 1.442695, %v722_v54  ;;  %822 = vmatpush.msra.mxu0 %v799_v27  ;;  %v711_v54 = vld [vmem:[%s2067_s2 + $0x18] sm:$0xff] }
 0x1d4   :  { %1081 = vmatpush.msrb.mxu2 %v798_v28  ;;  %v849_v27 = vld [vmem:[%s2070_s11 + $0x18] sm:$0xff] }
 0x1d5   :  { %v726_v39 = vmul.f32 1.442695, %v717_v37  ;;  %823 = vmatpush.msra.mxu0 %v798_v28  ;;  %878 = vmatpush.msrb.mxu3 %v849_v27 }
 0x1d6   :  { %1082 = vmatpush.msrb.mxu2 %v797_v29 }
 0x1d7   :  { %1095 = vpow2.f32 %v726_v39  ;;  %824 = vmatpush.msra.mxu0 %v797_v29  ;;  %v847_v29 = vld [vmem:[%s2070_s11 + $0x8] sm:$0xff] }
 0x1d8   :  { %v699_v45 = vpop.f32.mrf.mxu1  ;;  %1097 = vpow2.f32 %v732_v48  ;;  %1083 = vmatpush.msrb.mxu2 %v796_v30 }
 0x1d9   :  { %v1806_v46 = vadd.f32 %v699_v45, %v671_v41  ;;  %825 = vmatpush.msra.mxu0 %v796_v30  ;;  %v708_v45 = vld [vmem:[%s2067_s2] sm:$0xff] }
 0x1da   :  { %1084 = vmatpush.msrb.mxu2 %v795_v31 }
 0x1db   :  { %v719_v51 = vmul.f32 0.5, %v1806_v46  ;;  %826 = vmatpush.msra.mxu0 %v795_v31 }
 0x1dc   :  { %1085 = vmatpush.msrb.mxu2 %v794_v32 }
 0x1dd   :  { %v1096_v52 = vpop.eup %1095  ;;  %v730_v53 = vmul.f32 1.442695, %v719_v51  ;;  %827 = vmatpush.msra.mxu0 %v794_v32 }
 0x1de   :  { %750 = vrot.lane.b32.xlu0 %v1096_v52, %s1108_s8  ;;  %v1098_v62 = vpop.eup %1097  ;;  %1086 = vmatpush.msrb.mxu2 %v793_v33 }
 0x1df   :  { %1099 = vpow2.f32 %v730_v53  ;;  %828 = vmatpush.msra.mxu0 %v793_v33  ;;  %v846_v33 = vld [vmem:[%s2070_s11] sm:$0xff] }
 0x1e0   :  { %v702_v57 = vpop.f32.mrf.mxu1  ;;  %1101 = vpow2.f32 %v736_v59  ;;  %v712_v59 = vld [vmem:[%s2067_s2 + $0x20] sm:$0xff] }
 0x1e1   :  { %v703_v58 = vadd.f32 %v702_v57, %v674_v56 }
 0x1e3   :  { %v721_v60 = vmul.f32 0.5, %v703_v58 }
 0x1e5   :  { %v1100_v0 = vpop.eup %1099  ;;  %v734_v2 = vmul.f32 1.442695, %v721_v60 }
 0x1e6   :  { %754 = vrot.lane.b32.xlu2 %v1100_v0, %s1108_s8  ;;  %756 = vrot.lane.b32.xlu0 %v1098_v62, %s1108_s8  ;;  %v1102_v9 = vpop.eup %1101 }
 0x1e7   :  { %1103 = vpow2.f32 %v734_v2 }
 0x1e8   :  { %v705_v4 = vpop.f32.mrf.mxu1 }
 0x1e9   :  { %v706_v5 = vadd.f32 %v705_v4, %v677_v3  ;;  %v715_v3 = vld [vmem:[%s2067_s2 + $0x38] sm:$0xff]  ;;  %v714_v4 = vld [vmem:[%s2067_s2 + $0x30] sm:$0xff] }
 0x1eb   :  { %v723_v8 = vmul.f32 0.5, %v706_v5 }
 0x1ed   :  { %v1104_v10 = vpop.eup %1103  ;;  %v738_v12 = vmul.f32 1.442695, %v723_v8 }
 0x1ee   :  { %758 = vrot.lane.b32.xlu1 %v1104_v10, %s1108_s8  ;;  %760 = vrot.lane.b32.xlu2 %v1102_v9, %s1108_s8 }
 0x1ef   :  { %1105 = vpow2.f32 %v738_v12 }
 0x1f5   :  { %v1106_v13 = vpop.eup %1105 }
 0x1f6   :  { %905 = vrot.lane.b32.xlu2 %v1784_v11, %s1107_s26  ;;  %762 = vrot.lane.b32.xlu0 %v1106_v13, %s1108_s8 }
 0x1f7   :  { %903 = vrot.lane.b32.xlu1 %v1779_v6, %s1107_s26 }
 0x1fe   :  { %911 = vrot.lane.b32.xlu2 %v1825_v16, %s1107_s26  ;;  %907 = vrot.lane.b32.xlu0 %v1787_v14, %s1107_s26 }
 0x1ff   :  { %909 = vrot.lane.b32.xlu1 %v1791_v20, %s1107_s26 }
 0x206   :  { %917 = vrot.lane.b32.xlu2 %v1808_v50, %s1107_s26  ;;  %913 = vrot.lane.b32.xlu0 %v1802_v36, %s1107_s26 }
 0x207   :  { %915 = vrot.lane.b32.xlu1 %v1851_v24, %s1107_s26 }
 0x20e   :  { %939 = vrot.lane.b32.xlu2 %v703_v58, %s1107_s26  ;;  %935 = vrot.lane.b32.xlu0 %v1800_v35, %s1107_s26  ;;  %v710_v35 = vld [vmem:[%s2067_s2 + $0x10] sm:$0xff] }
 0x20f   :  { %937 = vrot.lane.b32.xlu1 %v1806_v46, %s1107_s26 }
 0x216   :  { %941 = vrot.lane.b32.xlu0 %v706_v5, %s1107_s26 }
 0x21e   :  { %v749_v34 = vpop.permute.xlu2 %748 }
 0x23e   :  { %v753_v37 = vpop.permute.xlu1 %752 }
 0x240   :  { %v755_v38 = vpop.permute.xlu2 %754 }
 0x241   :  { %v766_v39 = vsel %vm764_vm2, %v753_v37, %v755_v38  ;;  %v780_v56 = vmul.f32 %v755_v38, %v711_v54 }
 0x242   :  { %v779_v40 = vmul.f32 %v766_v39, %v710_v35 }
 0x244   :  { %v787_v41 = vadd.f32 %v779_v40, %v1787_v14 }
 0x246   :  { %967 = vrot.lane.b32.xlu0 %v787_v41, %s1108_s8  ;;  %832 = vmatmul.f32.vlgmr.msrb.gmra.mxu2 %v787_v41 }
 0x248   :  { %v761_v42 = vpop.permute.xlu2 %760 }
 0x250   :  { %v1910_v46 = vpop.permute.xlu2 %905  ;;  %v751_v47 = vpop.permute.xlu0 %750 }
 0x251   :  { %v765_v48 = vsel %vm764_vm2, %v749_v34, %v751_v47  ;;  %v778_v51 = vmul.f32 %v751_v47, %v709_v44 }
 0x252   :  { %v777_v52 = vmul.f32 %v765_v48, %v708_v45 }
 0x253   :  { %v786_v14 = vadd.f32 %v778_v51, %v1784_v11  ;;  %v713_v11 = vld [vmem:[%s2067_s2 + $0x28] sm:$0xff] }
 0x254   :  { %v785_v53 = vadd.f32 %v777_v52, %v1779_v6  ;;  %v788_v6 = vadd.f32 %v780_v56, %v1791_v20 }
 0x255   :  { %965 = vrot.lane.b32.xlu2 %v786_v14, %s1108_s8 }
 0x256   :  { %963 = vrot.lane.b32.xlu1 %v785_v53, %s1108_s8  ;;  %829 = vmatmul.f32.vlgmr.msra.gmra.mxu0 %v785_v53 }
 0x258   :  { %v912_v57 = vpop.permute.xlu2 %911  ;;  %v757_v60 = vpop.permute.xlu0 %756 }
 0x259   :  { %v993_v58 = vsel %vm62_vm0, %v1753_v55, %v912_v57 }
 0x25a   :  { %1016 = vst [vmem:[%s2064_s13 + $0x68] sm:$0xff] %v993_v58 }
 0x25e   :  { %969 = vrot.lane.b32.xlu1 %v788_v6, %s1108_s8 }
 0x260   :  { %v759_v62 = vpop.permute.xlu1 %758  ;;  %v918_v23 = vpop.permute.xlu2 %917 }
 0x261   :  { %v767_v55 = vsel %vm764_vm2, %v757_v60, %v759_v62  ;;  %v782_v63 = vmul.f32 %v759_v62, %v713_v11 }
 0x262   :  { %v781_v0 = vmul.f32 %v767_v55, %v712_v59 }
 0x263   :  { %v790_v2 = vadd.f32 %v782_v63, %v1802_v36 }
 0x264   :  { %v789_v20 = vadd.f32 %v781_v0, %v1825_v16 }
 0x265   :  { %973 = vrot.lane.b32.xlu0 %v790_v2, %s1108_s8 }
 0x266   :  { %971 = vrot.lane.b32.xlu2 %v789_v20, %s1108_s8  ;;  %835 = vmatmul.f32.gmra.mxu2 %v789_v20 }
 0x268   :  { %v763_v5 = vpop.permute.xlu0 %762  ;;  %v940_v30 = vpop.permute.xlu2 %939 }
 0x269   :  { %v768_v8 = vsel %vm764_vm2, %v761_v42, %v763_v5  ;;  %v784_v9 = vmul.f32 %v763_v5, %v715_v3  ;;  %v904_v36 = vpop.permute.xlu1 %903  ;;  %v1090_v5 = vld [vmem:[%s2069_s12] ss:$0 sm:$0xff] }
 0x26a   :  { %v783_v10 = vmul.f32 %v768_v8, %v714_v4  ;;  %v919_v12 = vsel %vm62_vm0, %v904_v36, %v1910_v46  ;;  %v991_v13 = vsel %vm62_vm0, %v1740_v43, %v904_v36 }
 0x26b   :  { %v792_v15 = vadd.f32 %v784_v9, %v1808_v50  ;;  %v995_v16 = vsel %vm263_vm1, %v919_v12, %v1910_v46  ;;  %1004 = vst [vmem:[%s2064_s13 + $0x8] sm:$0xff] %v991_v13 }
 0x26c   :  { %1005 = vst [vmem:[%s2064_s13 + $0x10] sm:$0xff] %v995_v16  ;;  %v791_v18 = vadd.f32 %v783_v10, %v1851_v24 }
 0x26e   :  { %977 = vrot.lane.b32.xlu2 %v792_v15, %s1108_s8  ;;  %838 = vmatmul.f32.gmra.mxu2 %v791_v18 }
 0x26f   :  { %975 = vrot.lane.b32.xlu1 %v791_v18, %s1108_s8 }
 0x270   :  { %v908_v43 = vpop.permute.xlu0 %907 }
 0x271   :  { %v992_v50 = vsel %vm62_vm0, %v1747_v49, %v908_v43  ;;  %v910_v19 = vpop.permute.xlu1 %909 }
 0x272   :  { %1010 = vst [vmem:[%s2064_s13 + $0x38] sm:$0xff] %v992_v50  ;;  %v920_v7 = vsel %vm62_vm0, %v908_v43, %v910_v19 }
 0x273   :  { %v996_v21 = vsel %vm263_vm1, %v920_v7, %v910_v19 }
 0x274   :  { %1011 = vst [vmem:[%s2064_s13 + $0x40] sm:$0xff] %v996_v21 }
 0x278   :  { %v914_v22 = vpop.permute.xlu0 %913 }
 0x279   :  { %v921_v24 = vsel %vm62_vm0, %v912_v57, %v914_v22  ;;  %v916_v1 = vpop.permute.xlu1 %915  ;;  %v945_v39 = vsel %vm62_vm0, %v914_v22, %v940_v30 }
 0x27a   :  { %v997_v49 = vsel %vm263_vm1, %v921_v24, %v914_v22  ;;  %v922_v17 = vsel %vm62_vm0, %v916_v1, %v918_v23  ;;  %v994_v25 = vsel %vm62_vm0, %v1759_v61, %v916_v1  ;;  %v848_v61 = vld [vmem:[%s2070_s11 + $0x10] sm:$0xff] }
 0x27b   :  { %1017 = vst [vmem:[%s2064_s13 + $0x70] sm:$0xff] %v997_v49  ;;  %v998_v26 = vsel %vm263_vm1, %v922_v17, %v918_v23  ;;  %879 = vmatpush.msrb.mxu3 %v848_v61 }
 0x27c   :  { %1022 = vst [vmem:[%s2064_s13 + $0x98] sm:$0xff] %v994_v25 }
 0x27d   :  { %1023 = vst [vmem:[%s2064_s13 + $0xa0] sm:$0xff] %v998_v26  ;;  %880 = vmatpush.msrb.mxu3 %v847_v29 }
 0x27f   :  { %881 = vmatpush.msrb.mxu3 %v846_v33 }
 0x280   :  { %v936_v28 = vpop.permute.xlu0 %935 }
 0x281   :  { %v938_v32 = vpop.permute.xlu1 %937  ;;  %v943_v42 = vsel %vm62_vm0, %v1910_v46, %v936_v28  ;;  %v1089_v46 = vld [vmem:[%s2068_s10] ss:$0 sm:$0xff] }
 0x282   :  { %v944_v34 = vsel %vm62_vm0, %v910_v19, %v938_v32 }
 0x288   :  { %v942_v31 = vpop.permute.xlu0 %941 }
 0x289   :  { %v946_v11 = vsel %vm62_vm0, %v918_v23, %v942_v31 }
 0x2af   :  { %v966_v35 = vpop.permute.xlu2 %965 }
 0x2b8   :  { %v968_v37 = vpop.permute.xlu0 %967 }
 0x2b9   :  { %v1000_v38 = vsel %vm764_vm2, %v944_v34, %v968_v37 }
 0x2ba   :  { %1012 = vst [vmem:[%s2064_s13 + $0x48] sm:$0xff] %v1000_v38 }
 0x2c0   :  { %v972_v40 = vpop.permute.xlu2 %971 }
 0x2c1   :  { %v1001_v41 = vsel %vm764_vm2, %v945_v39, %v972_v40 }
 0x2c2   :  { %1018 = vst [vmem:[%s2064_s13 + $0x78] sm:$0xff] %v1001_v41 }
 0x2c8   :  { %v964_v44 = vpop.permute.xlu1 %963  ;;  %v978_v59 = vpop.permute.xlu2 %977 }
 0x2c9   :  { %v979_v45 = vsel %vm764_vm2, %v964_v44, %v966_v35  ;;  %v999_v47 = vsel %vm764_vm2, %v943_v42, %v964_v44  ;;  %v833_v54 = vpop.f32.mrf.mxu2 }
 0x2ca   :  { %1006 = vst [vmem:[%s2064_s13 + $0x18] sm:$0xff] %v999_v47  ;;  %v834_v58 = vadd.f32 %v1089_v46, %v833_v54 }
 0x2cb   :  { %1007 = vst [vmem:[%s2064_s13 + $0x20] sm:$0xff] %v979_v45 }
 0x2cc   :  { %v843_v6 = vmax.f32 %v834_v58, 0.0 }
 0x2d0   :  { %v970_v48 = vpop.permute.xlu1 %969 }
 0x2d1   :  { %v980_v51 = vsel %vm764_vm2, %v968_v37, %v970_v48 }
 0x2d2   :  { %1013 = vst [vmem:[%s2064_s13 + $0x50] sm:$0xff] %v980_v51 }
 0x2d3   :  { %v830_v52 = vpop.f32.mrf.mxu0 }
 0x2d4   :  { %v831_v14 = vadd.f32 %v1089_v46, %v830_v52 }
 0x2d6   :  { %v842_v53 = vmax.f32 %v831_v14, 0.0 }
 0x2d7   :  { %v974_v56 = vpop.permute.xlu0 %973 }
 0x2d8   :  { %v981_v57 = vsel %vm764_vm2, %v972_v40, %v974_v56  ;;  %1059 = vmatmul.msk.f32.vlgmr.msrb.gmra.mxu3 %vm62_vm0, %v842_v53 }
 0x2d9   :  { %1019 = vst [vmem:[%s2064_s13 + $0x80] sm:$0xff] %v981_v57 }
 0x2e0   :  { %1060 = vmatmul.msk.f32.gmra.mxu3 %vm62_vm0, %v843_v6 }
 0x2e1   :  { %v976_v60 = vpop.permute.xlu1 %975 }
 0x2e2   :  { %v982_v62 = vsel %vm764_vm2, %v976_v60, %v978_v59  ;;  %v1002_v55 = vsel %vm764_vm2, %v946_v11, %v976_v60 }
 0x2e3   :  { %1024 = vst [vmem:[%s2064_s13 + $0xa8] sm:$0xff] %v1002_v55 }
 0x2e4   :  { %1025 = vst [vmem:[%s2064_s13 + $0xb0] sm:$0xff] %v982_v62 }
 0x2e9   :  { %v836_v63 = vpop.f32.mrf.mxu2 }
 0x2ea   :  { %v837_v0 = vadd.f32 %v1089_v46, %v836_v63 }
 0x2ec   :  { %v844_v2 = vmax.f32 %v837_v0, 0.0 }
 0x2ee   :  { %1061 = vmatmul.msk.f32.gmra.mxu3 %vm62_vm0, %v844_v2 }
 0x2f1   :  { %v839_v20 = vpop.f32.mrf.mxu2 }
 0x2f2   :  { %v840_v3 = vadd.f32 %v1089_v46, %v839_v20 }
 0x2f4   :  { %v845_v4 = vmax.f32 %v840_v3, 0.0 }
 0x2f6   :  { %1062 = vmatmul.msk.f32.gmra.mxu3 %vm62_vm0, %v845_v4 }
 0x35b   :  { %v883_v8 = vpop.f32.mrf.mxu3 }
 0x35c   :  { %v884_v9 = vadd.f32 %v1090_v5, %v883_v8 }
 0x35e   :  { %1008 = vst [vmem:[%s2064_s13 + $0x28] sm:$0xff] %v884_v9 }
 0x363   :  { %v886_v36 = vpop.f32.mrf.mxu3 }
 0x364   :  { %v887_v10 = vadd.f32 %v1090_v5, %v886_v36 }
 0x366   :  { %1014 = vst [vmem:[%s2064_s13 + $0x58] sm:$0xff] %v887_v10 }
 0x371   :  { %v889_v12 = vpop.f32.mrf.mxu3 }
 0x372   :  { %v890_v13 = vadd.f32 %v1090_v5, %v889_v12 }
 0x374   :  { %1020 = vst [vmem:[%s2064_s13 + $0x88] sm:$0xff] %v890_v13 }
 0x379   :  { %v892_v15 = vpop.f32.mrf.mxu3 }
 0x37a   :  { %v893_v16 = vadd.f32 %v1090_v5, %v892_v15 }
 0x37c   :  { %1026 = vst [vmem:[%s2064_s13 + $0xb8] sm:$0xff] %v893_v16 }

</bundles_post_ra>
